<compile_context>
chip_gen: v6e
topology: v6e:2x2x1
jax: 0.10.0
libtpu: 0.0.40
codegen_flags: <defaults>
</compile_context>

<pallas_src>
import numpy as np
import jax
import jax.numpy as jnp
from jax.experimental import pallas as pl
from jax.experimental.pallas import tpu as pltpu


# --------------------------------------------------------------------------
# B-spline basis construction (numpy, deterministic; mirrors bs/spline_factory
# from the reference implementation, using Cox-de Boor instead of scipy.splev)
# --------------------------------------------------------------------------
def _bspline_basis_all(x, knots, degree):
    x = np.asarray(x, dtype=float)
    knots = np.asarray(knots, dtype=float)
    m = len(knots)
    n_basis = m - degree - 1
    B = np.zeros((x.shape[0], m - 1))
    nonempty = [j for j in range(m - 1) if knots[j] < knots[j + 1]]
    for j in nonempty:
        B[:, j] = ((x >= knots[j]) & (x < knots[j + 1])).astype(float)
    B[x == knots[-1], nonempty[-1]] = 1.0
    for d in range(1, degree + 1):
        Bn = np.zeros((x.shape[0], m - 1 - d))
        for j in range(m - 1 - d):
            den1 = knots[j + d] - knots[j]
            den2 = knots[j + d + 1] - knots[j + 1]
            t1 = ((x - knots[j]) / den1) * B[:, j] if den1 > 0 else 0.0
            t2 = ((knots[j + d + 1] - x) / den2) * B[:, j + 1] if den2 > 0 else 0.0
            Bn[:, j] = t1 + t2
        B = Bn
    return B[:, :n_basis]


def bs(x, df=None, knots=None, degree=3, intercept=False):
    order = degree + 1
    inner_knots = []
    if df is not None and knots is None:
        n_inner_knots = df - order + (1 - intercept)
        if n_inner_knots < 0:
            n_inner_knots = 0
        if n_inner_knots > 0:
            inner_knots = np.percentile(
                x, 100 * np.linspace(0, 1, n_inner_knots + 2)[1:-1])
    elif knots is not None:
        inner_knots = knots
    all_knots = np.concatenate(([np.min(x), np.max(x)] * order, inner_knots))
    all_knots.sort()
    basis = _bspline_basis_all(np.asarray(x, dtype=float), all_knots, degree)
    if not intercept:
        basis = basis[:, 1:]
    return basis


def spline_factory(n, df, log=False):
    # (log=False path only; PredictionHead uses log=False)
    dist = np.arange(n)
    return bs(dist, df=df, intercept=True).astype(np.float32)


def _round_up(x, m):
    return ((x + m - 1) // m) * m


# --------------------------------------------------------------------------
# Fused Pallas kernel: Linear+ReLU x3 + all-heads Linear + Softplus.
# All matmuls take bf16 operands with f32 MXU accumulation.
# --------------------------------------------------------------------------
def _fused_mlp_head_kernel(x_ref, w1_ref, b1_ref, w2_ref, b2_ref, w3_ref,
                           b3_ref, wh_ref, bh_ref, o_ref):
    # Activation tile arrives in f32 (saves a standalone host cast kernel);
    # cast once to bf16 for the MXU.
    a = x_ref[...].astype(jnp.bfloat16)
    # Layer 1: (TM, d_in) @ (d_in, 16E)
    h = jnp.dot(a, w1_ref[...],
                preferred_element_type=jnp.float32) + b1_ref[...]
    h = jnp.maximum(h, 0.0).astype(jnp.bfloat16)
    # Layer 2: 16E -> 12E + ReLU   (Dropout = identity at inference)
    h = jnp.dot(h, w2_ref[...],
                preferred_element_type=jnp.float32) + b2_ref[...]
    h = jnp.maximum(h, 0.0).astype(jnp.bfloat16)
    # Layer 3: 12E -> 8E + ReLU
    h = jnp.dot(h, w3_ref[...],
                preferred_element_type=jnp.float32) + b3_ref[...]
    h = jnp.maximum(h, 0.0).astype(jnp.bfloat16)
    # All genome heads at once: 8E -> N_pad (lane-dense), then Softplus.
    z = jnp.dot(h, wh_ref[...],
                preferred_element_type=jnp.float32) + bh_ref[...]
    # torch.nn.Softplus(beta=1, threshold=20)
    o_ref[...] = jnp.where(z > 20.0, z,
                           jnp.log1p(jnp.exp(jnp.minimum(z, 20.0))))


# --------------------------------------------------------------------------
# Parameter init + forward wrapper
# --------------------------------------------------------------------------
def init_prediction_head_params(key, embed_dim, n_features):
    def linear(k, fan_in, fan_out):
        kw, kb = jax.random.split(k)
        bound = 1.0 / np.sqrt(fan_in)
        w = jax.random.uniform(kw, (fan_in, fan_out), jnp.float32, -bound, bound)
        b = jax.random.uniform(kb, (1, fan_out), jnp.float32, -bound, bound)
        return w, b

    keys = jax.random.split(key, 3 + len(n_features))
    d16, d12, d8 = 16 * embed_dim, 12 * embed_dim, 8 * embed_dim
    w1, b1 = linear(keys[0], d16, d16)
    w2, b2 = linear(keys[1], d16, d12)
    w3, b3 = linear(keys[2], d12, d8)
    head_w, head_b = [], []
    for i, nf in enumerate(n_features):
        w, b = linear(keys[3 + i], d8, nf)
        head_w.append(w)
        head_b.append(b)
    return dict(w1=w1, b1=b1, w2=w2, b2=b2, w3=w3, b3=b3,
                head_w=head_w, head_b=head_b)


def prediction_head_forward(x, spline_mat, params, embed_dim,
                            spline_bins=16, bit=0):
    # x: (B, E, S) float32  (torch layout: spline contracts the last axis)
    B, E, S = x.shape
    assert E == embed_dim
    d16, d12, d8 = 16 * E, 12 * E, 8 * E

    # ---- host-side preparation (plain XLA ops) -----------------------------
    # Spline handling, gated on S (fold inflates layer-1 work by ~S/16):
    #   * S small : fold spline into W1 ->  W1_eff[e*S+s, j] = sum_k sp[s,k] W1[e*16+k, j]
    #   * S large : do the spline contraction as one small XLA einsum and feed
    #               the (B, 16E) activations to the kernel with the original W1.
    fold_spline = S <= 2 * spline_bins
    if fold_spline:
        d_in = E * S
        w1r = params["w1"].reshape(E, spline_bins, d16)
        w1_eff = jnp.einsum("sk,ekj->esj", spline_mat.astype(jnp.float32),
                            w1r).reshape(d_in, d16)
        a_in = x.reshape(B, d_in)                                   # f32
    else:
        d_in = d16
        w1_eff = params["w1"]
        a_in = jnp.einsum("bes,sk->bek", x,
                          spline_mat.astype(jnp.float32)).reshape(B, d_in)

    # Concatenate all per-genome heads, pad N to a multiple of 128 (lane-dense
    # output, no recompile per `bit`).
    n_features = [int(w.shape[1]) for w in params["head_w"]]
    wh_all = jnp.concatenate(params["head_w"], axis=1)              # (8E, sum_nf)
    bh_all = jnp.concatenate(params["head_b"], axis=1)              # (1,  sum_nf)
    n_tot = wh_all.shape[1]
    n_pad = _round_up(n_tot, 128)
    wh_all = jnp.pad(wh_all, ((0, 0), (0, n_pad - n_tot)))
    bh_all = jnp.pad(bh_all, ((0, 0), (0, n_pad - n_tot)))

    # bf16 weights; f32 biases, accumulation and output.
    w1b = w1_eff.astype(jnp.bfloat16)
    w2b = params["w2"].astype(jnp.bfloat16)
    w3b = params["w3"].astype(jnp.bfloat16)
    whb = wh_all.astype(jnp.bfloat16)
    b1, b2, b3 = params["b1"], params["b2"], params["b3"]

    # ---- batch tiling -------------------------------------------------------
    # Aim for >= 8 grid steps on large batches (megacore sharding + per-step
    # overhead amortisation); cap TM at 512; floor at 8 sublanes; shrink if the
    # pipeline footprint would exceed a conservative VMEM budget.
    b_pad8 = _round_up(max(B, 1), 8)
    tm = min(512, max(8, _round_up(-(-b_pad8 // 8), 8)))

    weight_bytes = (2 * (d_in * d16 + d16 * d12 + d12 * d8 + d8 * n_pad)
                    + 4 * (d16 + d12 + d8 + n_pad))

    def _vmem_est(t):
        x_tile = 2 * t * d_in * 4          # f32 input tile, double-buffered
        out_tile = 2 * t * n_pad * 4       # f32 output tile, double-buffered
        interm = 2 * t * max(d16, d12, d8, n_pad) * 4   # in-kernel temporaries
        return x_tile + out_tile + weight_bytes + interm

    VMEM_BUDGET = 24 * 1024 * 1024
    while tm > 8 and _vmem_est(tm) > VMEM_BUDGET:
        tm = max(8, (tm // 2 // 8) * 8)
    b_pad = _round_up(b_pad8, tm)

    a2d = a_in.astype(jnp.float32)
    if b_pad != B:
        a2d = jnp.pad(a2d, ((0, b_pad - B), (0, 0)))

    flops = 2 * b_pad * (d_in * d16 + d16 * d12 + d12 * d8 + d8 * n_pad)
    bytes_accessed = a2d.size * 4 + weight_bytes + b_pad * n_pad * 4
    vmem_limit = int(max(_vmem_est(tm) + 8 * 1024 * 1024, 16 * 1024 * 1024))

    def _resident(shape):
        # Constant index map -> block never changes -> single VMEM buffer.
        return pl.BlockSpec(shape, lambda i: (0, 0),
                            pipeline_mode=pl.Buffered(1))

    out_pad = pl.pallas_call(
        _fused_mlp_head_kernel,
        out_shape=jax.ShapeDtypeStruct((b_pad, n_pad), jnp.float32),
        grid_spec=pltpu.PrefetchScalarGridSpec(
            num_scalar_prefetch=0,
            grid=(b_pad // tm,),
            in_specs=[
                pl.BlockSpec((tm, d_in), lambda i: (i, 0)),   # activations (f32)
                _resident((d_in, d16)),                       # W1 (or folded W1)
                _resident((1, d16)),
                _resident((d16, d12)),
                _resident((1, d12)),
                _resident((d12, d8)),
                _resident((1, d8)),
                _resident((d8, n_pad)),                       # all heads
                _resident((1, n_pad)),
            ],
            out_specs=pl.BlockSpec((tm, n_pad), lambda i: (i, 0)),
        ),
        compiler_params=pltpu.CompilerParams(
            dimension_semantics=("parallel",),
            vmem_limit_bytes=vmem_limit),
        cost_estimate=pl.CostEstimate(flops=flops,
                                      transcendentals=2 * b_pad * n_pad,
                                      bytes_accessed=bytes_accessed),
    )(a2d, w1b, b1, w2b, b2, w3b, b3, whb, bh_all)

    # Select the requested genome head (static slice, no recompile per bit).
    start = int(np.sum(n_features[:bit]))
    return out_pad[:B, start:start + n_features[bit]]


# --------------------------------------------------------------------------
# Pure-JAX f32 reference (mirrors the torch forward) for a sanity check
# --------------------------------------------------------------------------
def _reference_forward(x, spline_mat, params, spline_bins, bit):
    B, E, S = x.shape
    spline_out = jnp.einsum("bes,sk->bek", x, spline_mat)        # (B, E, 16)
    flat = spline_out.reshape(B, E * spline_bins)                # view(B, 16E)
    h = jnp.maximum(flat @ params["w1"] + params["b1"], 0.0)
    h = jnp.maximum(h @ params["w2"] + params["b2"], 0.0)
    h = jnp.maximum(h @ params["w3"] + params["b3"], 0.0)
    z = h @ params["head_w"][bit] + params["head_b"][bit]
    return jnp.where(z > 20.0, z, jnp.log1p(jnp.exp(jnp.minimum(z, 20.0))))


# --------------------------------------------------------------------------
if __name__ == "__main__":
    spline_bins = 16
    # Config 0: S=64 > 2*bins -> host-side spline einsum + original W1 in kernel
    # Config 1: S=16 <= 2*bins -> spline folded into W1 on the host
    configs = [
        dict(batch=2, embed_dim=32, spatial=64, n_features=[10, 7], bit=0),
        dict(batch=4, embed_dim=16, spatial=16, n_features=[5], bit=0),
    ]

    key = jax.random.PRNGKey(0)
    for ci, cfg in enumerate(configs):
        key, kx, kp = jax.random.split(key, 3)
        B, E, S = cfg["batch"], cfg["embed_dim"], cfg["spatial"]
        bit = cfg["bit"]

        x = jax.random.normal(kx, (B, E, S), dtype=jnp.float32)
        params = init_prediction_head_params(kp, E, cfg["n_features"])

        # B-spline basis matrix (spatial, spline_bins), built from the spatial
        # dim exactly as BSplineTransformation does on first call.
        spline_mat = jnp.asarray(spline_factory(S, spline_bins, log=False))
        assert spline_mat.shape == (S, spline_bins)

        out = prediction_head_forward(x, spline_mat, params, E,
                                      spline_bins=spline_bins, bit=bit)
        out = jax.block_until_ready(out)

        assert out.shape == (B, cfg["n_features"][bit])
        assert bool(jnp.all(out >= 0.0))            # softplus is non-negative

        # Validate bf16 kernel against the f32 reference (relative L2 error).
        ref = _reference_forward(x, spline_mat, params, spline_bins, bit)
        rel_err = float(jnp.linalg.norm(out - ref) /
                        (jnp.linalg.norm(ref) + 1e-6))
        assert rel_err < 0.05, f"config {ci}: relative error too large: {rel_err}"

    print("KERNEL_OK")
</pallas_src>

<mosaic_0001>
module attributes {stable_mosaic.version = 11 : i64} {
  func.func @_fused_mlp_head_kernel(%arg0: i32, %arg1: memref<8x512xf32, #tpu.memory_space<vmem>>, %arg2: memref<512x512xbf16, #tpu.memory_space<vmem>>, %arg3: memref<1x512xf32, #tpu.memory_space<vmem>>, %arg4: memref<512x384xbf16, #tpu.memory_space<vmem>>, %arg5: memref<1x384xf32, #tpu.memory_space<vmem>>, %arg6: memref<384x256xbf16, #tpu.memory_space<vmem>>, %arg7: memref<1x256xf32, #tpu.memory_space<vmem>>, %arg8: memref<256x128xbf16, #tpu.memory_space<vmem>>, %arg9: memref<1x128xf32, #tpu.memory_space<vmem>>, %arg10: memref<8x128xf32, #tpu.memory_space<vmem>>) attributes {dimension_semantics = [#tpu.dimension_semantics<parallel>], iteration_bounds = array<i64: 1>, scalar_prefetch = 0 : i64, scratch_operands = 0 : i64, tpu.core_type = #tpu.core_type<tc>, window_params = [{transform_indices = @transform_0, window_bounds = array<i64: 8, 512>}, {pipeline_mode = #tpu.pipeline_mode<synchronous>, transform_indices = @transform_1, window_bounds = array<i64: 512, 512>}, {pipeline_mode = #tpu.pipeline_mode<synchronous>, transform_indices = @transform_2, window_bounds = array<i64: 1, 512>}, {pipeline_mode = #tpu.pipeline_mode<synchronous>, transform_indices = @transform_3, window_bounds = array<i64: 512, 384>}, {pipeline_mode = #tpu.pipeline_mode<synchronous>, transform_indices = @transform_4, window_bounds = array<i64: 1, 384>}, {pipeline_mode = #tpu.pipeline_mode<synchronous>, transform_indices = @transform_5, window_bounds = array<i64: 384, 256>}, {pipeline_mode = #tpu.pipeline_mode<synchronous>, transform_indices = @transform_6, window_bounds = array<i64: 1, 256>}, {pipeline_mode = #tpu.pipeline_mode<synchronous>, transform_indices = @transform_7, window_bounds = array<i64: 256, 128>}, {pipeline_mode = #tpu.pipeline_mode<synchronous>, transform_indices = @transform_8, window_bounds = array<i64: 1, 128>}, {transform_indices = @transform_9, window_bounds = array<i64: 8, 128>}]} {
    %c0 = arith.constant 0 : index
    %c0_0 = arith.constant 0 : index
    %0 = vector.load %arg1[%c0, %c0_0] : memref<8x512xf32, #tpu.memory_space<vmem>>, vector<8x512xf32>
    %1 = arith.truncf %0 : vector<8x512xf32> to vector<8x512xbf16>
    %c0_1 = arith.constant 0 : index
    %c0_2 = arith.constant 0 : index
    %2 = vector.load %arg2[%c0_1, %c0_2] : memref<512x512xbf16, #tpu.memory_space<vmem>>, vector<512x512xbf16>
    %cst = arith.constant dense<0.000000e+00> : vector<8x512xf32>
    %3 = tpu.matmul %1, %2, %cst {dimension_numbers = #tpu.dot_dimension_numbers<[1], [0], [0], [1], [0, 0, 1, 1], [], []>} : vector<8x512xbf16>, vector<512x512xbf16>, vector<8x512xf32> -> vector<8x512xf32>
    %c0_3 = arith.constant 0 : index
    %c0_4 = arith.constant 0 : index
    %4 = vector.load %arg3[%c0_3, %c0_4] : memref<1x512xf32, #tpu.memory_space<vmem>>, vector<1x512xf32>
    %5 = vector.broadcast %4 : vector<1x512xf32> to vector<8x512xf32>
    %6 = arith.addf %3, %5 : vector<8x512xf32>
    %cst_5 = arith.constant 0.000000e+00 : f32
    %7 = vector.broadcast %cst_5 : f32 to vector<8x512xf32>
    %8 = arith.maximumf %6, %7 : vector<8x512xf32>
    %9 = arith.truncf %8 : vector<8x512xf32> to vector<8x512xbf16>
    %c0_6 = arith.constant 0 : index
    %c0_7 = arith.constant 0 : index
    %10 = vector.load %arg4[%c0_6, %c0_7] : memref<512x384xbf16, #tpu.memory_space<vmem>>, vector<512x384xbf16>
    %cst_8 = arith.constant dense<0.000000e+00> : vector<8x384xf32>
    %11 = tpu.matmul %9, %10, %cst_8 {dimension_numbers = #tpu.dot_dimension_numbers<[1], [0], [0], [1], [0, 0, 1, 1], [], []>} : vector<8x512xbf16>, vector<512x384xbf16>, vector<8x384xf32> -> vector<8x384xf32>
    %c0_9 = arith.constant 0 : index
    %c0_10 = arith.constant 0 : index
    %12 = vector.load %arg5[%c0_9, %c0_10] : memref<1x384xf32, #tpu.memory_space<vmem>>, vector<1x384xf32>
    %13 = vector.broadcast %12 : vector<1x384xf32> to vector<8x384xf32>
    %14 = arith.addf %11, %13 : vector<8x384xf32>
    %cst_11 = arith.constant 0.000000e+00 : f32
    %15 = vector.broadcast %cst_11 : f32 to vector<8x384xf32>
    %16 = arith.maximumf %14, %15 : vector<8x384xf32>
    %17 = arith.truncf %16 : vector<8x384xf32> to vector<8x384xbf16>
    %c0_12 = arith.constant 0 : index
    %c0_13 = arith.constant 0 : index
    %18 = vector.load %arg6[%c0_12, %c0_13] : memref<384x256xbf16, #tpu.memory_space<vmem>>, vector<384x256xbf16>
    %cst_14 = arith.constant dense<0.000000e+00> : vector<8x256xf32>
    %19 = tpu.matmul %17, %18, %cst_14 {dimension_numbers = #tpu.dot_dimension_numbers<[1], [0], [0], [1], [0, 0, 1, 1], [], []>} : vector<8x384xbf16>, vector<384x256xbf16>, vector<8x256xf32> -> vector<8x256xf32>
    %c0_15 = arith.constant 0 : index
    %c0_16 = arith.constant 0 : index
    %20 = vector.load %arg7[%c0_15, %c0_16] : memref<1x256xf32, #tpu.memory_space<vmem>>, vector<1x256xf32>
    %21 = vector.broadcast %20 : vector<1x256xf32> to vector<8x256xf32>
    %22 = arith.addf %19, %21 : vector<8x256xf32>
    %cst_17 = arith.constant 0.000000e+00 : f32
    %23 = vector.broadcast %cst_17 : f32 to vector<8x256xf32>
    %24 = arith.maximumf %22, %23 : vector<8x256xf32>
    %25 = arith.truncf %24 : vector<8x256xf32> to vector<8x256xbf16>
    %c0_18 = arith.constant 0 : index
    %c0_19 = arith.constant 0 : index
    %26 = vector.load %arg8[%c0_18, %c0_19] : memref<256x128xbf16, #tpu.memory_space<vmem>>, vector<256x128xbf16>
    %cst_20 = arith.constant dense<0.000000e+00> : vector<8x128xf32>
    %27 = tpu.matmul %25, %26, %cst_20 {dimension_numbers = #tpu.dot_dimension_numbers<[1], [0], [0], [1], [0, 0, 1, 1], [], []>} : vector<8x256xbf16>, vector<256x128xbf16>, vector<8x128xf32> -> vector<8x128xf32>
    %c0_21 = arith.constant 0 : index
    %c0_22 = arith.constant 0 : index
    %28 = vector.load %arg9[%c0_21, %c0_22] : memref<1x128xf32, #tpu.memory_space<vmem>>, vector<1x128xf32>
    %29 = vector.broadcast %28 : vector<1x128xf32> to vector<8x128xf32>
    %30 = arith.addf %27, %29 : vector<8x128xf32>
    %cst_23 = arith.constant 2.000000e+01 : f32
    %31 = vector.broadcast %cst_23 : f32 to vector<8x128xf32>
    %32 = arith.cmpf ogt, %30, %31 : vector<8x128xf32>
    %cst_24 = arith.constant 2.000000e+01 : f32
    %33 = vector.broadcast %cst_24 : f32 to vector<8x128xf32>
    %34 = arith.minimumf %30, %33 : vector<8x128xf32>
    %35 = math.exp %34 : vector<8x128xf32>
    %36 = math.log1p %35 : vector<8x128xf32>
    %37 = arith.select %32, %30, %36 : vector<8x128xi1>, vector<8x128xf32>
    %c0_25 = arith.constant 0 : index
    %c0_26 = arith.constant 0 : index
    %38 = vector.load %arg10[%c0_25, %c0_26] : memref<8x128xf32, #tpu.memory_space<vmem>>, vector<8x128xf32>
    tpu.vector_store %arg10[%c0_25, %c0_26], %37 {strides = array<i32>} : memref<8x128xf32, #tpu.memory_space<vmem>>, vector<8x128xf32>,
    return
  }
  func.func @transform_0(%arg0: i32) -> (i32, i32) {
    %c0_i32 = arith.constant 0 : i32
    %c0_i32_0 = arith.constant 0 : i32
    return %arg0, %c0_i32 : i32, i32
  }
  func.func @transform_1(%arg0: i32) -> (i32, i32) {
    %c0_i32 = arith.constant 0 : i32
    %c0_i32_0 = arith.constant 0 : i32
    %c0_i32_1 = arith.constant 0 : i32
    return %c0_i32, %c0_i32_0 : i32, i32
  }
  func.func @transform_2(%arg0: i32) -> (i32, i32) {
    %c0_i32 = arith.constant 0 : i32
    %c0_i32_0 = arith.constant 0 : i32
    %c0_i32_1 = arith.constant 0 : i32
    return %c0_i32, %c0_i32_0 : i32, i32
  }
  func.func @transform_3(%arg0: i32) -> (i32, i32) {
    %c0_i32 = arith.constant 0 : i32
    %c0_i32_0 = arith.constant 0 : i32
    %c0_i32_1 = arith.constant 0 : i32
    return %c0_i32, %c0_i32_0 : i32, i32
  }
  func.func @transform_4(%arg0: i32) -> (i32, i32) {
    %c0_i32 = arith.constant 0 : i32
    %c0_i32_0 = arith.constant 0 : i32
    %c0_i32_1 = arith.constant 0 : i32
    return %c0_i32, %c0_i32_0 : i32, i32
  }
  func.func @transform_5(%arg0: i32) -> (i32, i32) {
    %c0_i32 = arith.constant 0 : i32
    %c0_i32_0 = arith.constant 0 : i32
    %c0_i32_1 = arith.constant 0 : i32
    return %c0_i32, %c0_i32_0 : i32, i32
  }
  func.func @transform_6(%arg0: i32) -> (i32, i32) {
    %c0_i32 = arith.constant 0 : i32
    %c0_i32_0 = arith.constant 0 : i32
    %c0_i32_1 = arith.constant 0 : i32
    return %c0_i32, %c0_i32_0 : i32, i32
  }
  func.func @transform_7(%arg0: i32) -> (i32, i32) {
    %c0_i32 = arith.constant 0 : i32
    %c0_i32_0 = arith.constant 0 : i32
    %c0_i32_1 = arith.constant 0 : i32
    return %c0_i32, %c0_i32_0 : i32, i32
  }
  func.func @transform_8(%arg0: i32) -> (i32, i32) {
    %c0_i32 = arith.constant 0 : i32
    %c0_i32_0 = arith.constant 0 : i32
    %c0_i32_1 = arith.constant 0 : i32
    return %c0_i32, %c0_i32_0 : i32, i32
  }
  func.func @transform_9(%arg0: i32) -> (i32, i32) {
    %c0_i32 = arith.constant 0 : i32
    %c0_i32_0 = arith.constant 0 : i32
    return %arg0, %c0_i32 : i32, i32
  }
}

</mosaic_0001>

<bundles_post_ra>
// kernel: tpu_custom_call.1
= control target key start
LH: loop header
LB: loop body
LE: loop exit
PB: predicated region body
PF: predicated region fallthrough
CT: control target
= control target key end

     0   :  { %14 = vsyncpa [#allocation3], 0  ;;  %s3562_s0 = inlined_call_operand.hbm [shape: f32[8,512], index: 0, kind: input, shape index: {}]   ;;  %s3563_s1 = inlined_call_operand.hbm [shape: bf16[512,512], index: 1, kind: input, shape index: {}]   ;;  %s3564_s2 = inlined_call_operand.hbm [shape: f32[1,512], index: 2, kind: input, shape index: {}]   ;;  %s3565_s3 = inlined_call_operand.hbm [shape: bf16[512,384], index: 3, kind: input, shape index: {}]   ;;  %s3566_s4 = inlined_call_operand.vmem [shape: f32[1,384], index: 4, kind: input, shape index: {}]   ;;  %s3567_s5 = inlined_call_operand.hbm [shape: bf16[384,256], index: 5, kind: input, shape index: {}]   ;;  %s3568_s6 = inlined_call_operand.vmem [shape: f32[1,256], index: 6, kind: input, shape index: {}]   ;;  %s3569_s7 = inlined_call_operand.hbm [shape: bf16[256,128], index: 7, kind: input, shape index: {}]   ;;  %s3570_s8 = inlined_call_operand.vmem [shape: f32[1,128], index: 8, kind: input, shape index: {}]   ;;  %s3571_s9 = inlined_call_operand.hbm [shape: f32[8,128], index: 9, kind: output, shape index: {}]  }
   0x1   :  { %15 = vsyncpa [#allocation6], 0 }
   0x2   :  { %16 = vsyncpa [#allocation9], 0 }
   0x3   :  { %17 = vsyncpa [#allocation12], 0 }
   0x4   :  { %18 = vsyncpa [#allocation4], 0  ;;  %s3434_s30 = smov [#allocation5]  }
   0x5   :  { %s34_s10 = sshll.u32 %s3434_s30, 4  ;;  %s35_s10 = int_to_ptr.vmem [resolvable:$true] %s34_s10 }
   0x6   :  { %s3292_s11 = scalar_lea.vmem %s35_s10, 16384  ;;  %p3297_p1 = scmp.lt.s32.totalorder %s35_s10, %s35_s10 }
   0x7   :  { %p3293_p0 = scmp.ne.s32.totalorder %s35_s10, %s3292_s11  ;;  %p3298_p2 = scmp.lt.s32.totalorder %s3292_s11, %s3292_s11 }
   0x9   :  { %p3299_p3 = por %p3298_p2, %p3297_p1 }
   0xb   :  { %p3300_p4 = pnand %p3299_p3, %p3293_p0 }
   0xd   :  { %3303 = shalt.err (!%p3300_p4)
}
   0xe   :  { %s3435_s12 = smov 256   ;;  %s3436_s13 = smov 16  }
   0xf   :  { %40 = dma.hbm_to_vmem [thread:$0]  %s3563_s1, 16384, %s35_s10, [#allocation6], %s3435_s12, %s3435_s12, %s3436_s13  }
  0x10   :  { %s3437_s16 = smov [#allocation8]  }
  0x11   :  { %s56_s17 = sshll.u32 %s3437_s16, 4  ;;  %s57_s17 = int_to_ptr.vmem [resolvable:$true] %s56_s17 }
  0x12   :  { %s3312_s18 = scalar_lea.vmem %s57_s17, 12288  ;;  %p3317_p6 = scmp.lt.s32.totalorder %s57_s17, %s57_s17 }
  0x13   :  { %p3313_p5 = scmp.ne.s32.totalorder %s57_s17, %s3312_s18  ;;  %p3318_p7 = scmp.lt.s32.totalorder %s3312_s18, %s3312_s18 }
  0x15   :  { %p3319_p8 = por %p3318_p7, %p3317_p6 }
  0x17   :  { %p3320_p9 = pnand %p3319_p8, %p3313_p5 }
  0x19   :  { %3323 = shalt.err (!%p3320_p9)
}
  0x1a   :  { %s3438_s19 = smov 192   ;;  %s3439_s20 = smov 12  }
  0x1b   :  { %62 = dma.hbm_to_vmem [thread:$0]  %s3565_s3, 12288, %s57_s17, [#allocation9], %s3438_s19, %s3438_s19, %s3439_s20  }
  0x1c   :  { %s3440_s23 = smov [#allocation2]   ;;  %s3441_s25 = smov [#allocation7]  }
  0x1d   :  { %s25_s24 = sshll.u32 %s3440_s23, 4  ;;  %s47_s1 = sshll.u32 %s3441_s25, 4  ;;  %s26_s24 = int_to_ptr.vmem [resolvable:$true] %s25_s24  ;;  %s48_s1 = int_to_ptr.vmem [resolvable:$true] %s47_s1 }
  0x1e   :  { %s3332_s26 = scalar_lea.vmem %s26_s24, 512  ;;  %p3337_p11 = scmp.lt.s32.totalorder %s26_s24, %s26_s24 }
  0x1f   :  { %p3333_p10 = scmp.ne.s32.totalorder %s26_s24, %s3332_s26  ;;  %p3338_p12 = scmp.lt.s32.totalorder %s3332_s26, %s3332_s26 }
  0x21   :  { %p3339_p13 = por %p3338_p12, %p3337_p11 }
  0x23   :  { %p3340_p0 = pnand %p3339_p13, %p3333_p10 }
  0x25   :  { %3343 = shalt.err (!%p3340_p0)
}
  0x26   :  { %28 = dma.hbm_to_vmem [thread:$0]  %s3562_s0, 512, %s26_s24, [#allocation3]  }
  0x27   :  { %s3352_s29 = scalar_lea.vmem %s48_s1, 64  ;;  %p3357_p2 = scmp.lt.s32.totalorder %s48_s1, %s48_s1 }
  0x28   :  { %p3353_p1 = scmp.ne.s32.totalorder %s48_s1, %s3352_s29  ;;  %p3358_p3 = scmp.lt.s32.totalorder %s3352_s29, %s3352_s29 }
  0x2a   :  { %p3359_p4 = por %p3358_p3, %p3357_p2 }
  0x2c   :  { %p3360_p5 = pnand %p3359_p4, %p3353_p1 }
  0x2e   :  { %3363 = shalt.err (!%p3360_p5)
}
  0x2f   :  { %50 = dma.hbm_to_vmem [thread:$0]  %s3564_s2, 64, %s48_s1, [#allocation6]  }
  0x30   :  { %s3442_s10 = smov [#allocation10]  }
  0x31   :  { %s70_s11 = sshll.u32 %s3442_s10, 4  ;;  %s71_s11 = int_to_ptr.vmem [resolvable:$true] %s70_s11 }
  0x32   :  { %s3372_s12 = scalar_lea.vmem %s71_s11, 6144  ;;  %p3377_p7 = scmp.lt.s32.totalorder %s71_s11, %s71_s11 }
  0x33   :  { %p3373_p6 = scmp.ne.s32.totalorder %s71_s11, %s3372_s12  ;;  %p3378_p8 = scmp.lt.s32.totalorder %s3372_s12, %s3372_s12 }
  0x35   :  { %p3379_p9 = por %p3378_p8, %p3377_p7 }
  0x37   :  { %p3380_p10 = pnand %p3379_p9, %p3373_p6 }
  0x39   :  { %3383 = shalt.err (!%p3380_p10)
}
  0x3a   :  { %s3443_s0 = smov 128   ;;  %s3444_s13 = smov 8  }
  0x3b   :  { %76 = dma.hbm_to_vmem [thread:$0]  %s3567_s5, 6144, %s71_s11, [#allocation9], %s3443_s0, %s3443_s0, %s3444_s13  }
  0x3c   :  { %s3445_s16 = smov [#allocation11]  }
  0x3d   :  { %s84_s17 = sshll.u32 %s3445_s16, 4  ;;  %s85_s17 = int_to_ptr.vmem [resolvable:$true] %s84_s17 }
  0x3e   :  { %s3392_s2 = scalar_lea.vmem %s85_s17, 2048  ;;  %p3397_p12 = scmp.lt.s32.totalorder %s85_s17, %s85_s17 }
  0x3f   :  { %p3393_p11 = scmp.ne.s32.totalorder %s85_s17, %s3392_s2  ;;  %p3398_p13 = scmp.lt.s32.totalorder %s3392_s2, %s3392_s2 }
  0x41   :  { %p3399_p0 = por %p3398_p13, %p3397_p12 }
  0x43   :  { %p3400_p1 = pnand %p3399_p0, %p3393_p11 }
  0x45   :  { %3403 = shalt.err (!%p3400_p1)
}
  0x46   :  { %s3446_s18 = smov 64   ;;  %s3447_s19 = smov 4  }
  0x47   :  { %90 = dma.hbm_to_vmem [thread:$0]  %s3569_s7, 2048, %s85_s17, [#allocation12], %s3446_s18, %s3446_s18, %s3447_s19  }
  0x48   :  { %3424 = dma.done.wait [#allocation3], 512  }
  0x49   :  { %3425 = vsyncadd [#allocation3], 4294966784 }
  0x4a   :  { %3426 = dma.done.wait [#allocation6], 16448  }
  0x4b   :  { %3427 = vsyncadd [#allocation6], 4294950848 }
  0x4c   :  { %3428 = dma.done.wait [#allocation9], 18432  }
  0x4d   :  { %3429 = vsyncadd [#allocation9], 4294948864 }
  0x4e   :  { %3430 = dma.done.wait [#allocation12], 2048  }
  0x4f   :  { %3431 = vsyncadd [#allocation12], 4294965248  ;;  %v2872_v0 = vld [vmem:[#allocation5 + $0xe4] ss:$16 sps:$4 sm:$0xff]   ;;  %v2876_v2 = vld [vmem:[#allocation5 + $0xe0] ss:$16 sps:$4 sm:$0xff]  }
  0x50   :  { %v2874_v1 = vld [vmem:[#allocation5 + $0x2e4] ss:$16 sps:$4 sm:$0xff]   ;;  %910 = vmatprep.subr.bf16.mxu0 %v2872_v0  ;;  %v2877_v3 = vld [vmem:[#allocation5 + $0x2e0] ss:$16 sps:$4 sm:$0xff]   ;;  %v113_v46 = vld [vmem:[#allocation2 + $0x8] sm:$0xff]  ;;  %s3449_s24 = smov [#allocation13]  }
  0x51   :  { %951 = vmatprep.subr.bf16.mxu1 %v2874_v1  ;;  %v2878_v4 = vld [vmem:[#allocation5 + $0xc4] ss:$16 sps:$4 sm:$0xff]   ;;  %911 = vmatpush1.bf16.msra.mxu0 %v2876_v2  ;;  %v2882_v6 = vld [vmem:[#allocation5 + $0xc0] ss:$16 sps:$4 sm:$0xff]   ;;  %v3518_v49 = vpack.c.bf16 %v113_v46, %v113_v46  ;;  %v115_v50 = vld [vmem:[#allocation2 + $0x18] sm:$0xff]  ;;  %s2489_s25 = sshll.u32 %s3449_s24, 4  ;;  %s2490_s25 = int_to_ptr.vmem [resolvable:$true] %s2489_s25 }
  0x52   :  { %952 = vmatpush1.bf16.msra.mxu1 %v2877_v3  ;;  %v2880_v5 = vld [vmem:[#allocation5 + $0x2c4] ss:$16 sps:$4 sm:$0xff]   ;;  %912 = vmatprep.subr.bf16.mxu0 %v2878_v4  ;;  %v2883_v7 = vld [vmem:[#allocation5 + $0x2c0] ss:$16 sps:$4 sm:$0xff]   ;;  %v119_v52 = vpack.c.bf16 %v115_v50, %v115_v50  ;;  %v3022_v46 = vld [vmem:[#allocation5 + $0x1c8] ss:$16 sps:$4 sm:$0xff]   ;;  %p3409_p3 = scmp.lt.s32.totalorder %s2490_s25, %s2490_s25 }
  0x53   :  { %953 = vmatprep.subr.bf16.mxu1 %v2880_v5  ;;  %v2884_v8 = vld [vmem:[#allocation5 + $0xa4] ss:$16 sps:$4 sm:$0xff]   ;;  %v2888_v10 = vld [vmem:[#allocation5 + $0xa0] ss:$16 sps:$4 sm:$0xff]   ;;  %942 = vmatprep.mubr.bf16.mxu0 %v3518_v49  ;;  %v3028_v50 = vld [vmem:[#allocation5 + $0x1a8] ss:$16 sps:$4 sm:$0xff]  }
  0x54   :  { %v2886_v9 = vld [vmem:[#allocation5 + $0x2a4] ss:$16 sps:$4 sm:$0xff]   ;;  %v2889_v11 = vld [vmem:[#allocation5 + $0x2a0] ss:$16 sps:$4 sm:$0xff]   ;;  %983 = vmatprep.mubr.bf16.mxu1 %v119_v52 }
  0x55   :  { %913 = vmatpush1.bf16.msra.mxu0 %v2882_v6  ;;  %v2890_v12 = vld [vmem:[#allocation5 + $0x84] ss:$16 sps:$4 sm:$0xff]   ;;  %v2894_v14 = vld [vmem:[#allocation5 + $0x80] ss:$16 sps:$4 sm:$0xff]   ;;  %v2970_v6 = vld [vmem:[#allocation5 + $0xec] ss:$16 sps:$4 sm:$0xff]  }
  0x56   :  { %954 = vmatpush1.bf16.msra.mxu1 %v2883_v7  ;;  %914 = vmatprep.subr.bf16.mxu0 %v2884_v8  ;;  %v2892_v13 = vld [vmem:[#allocation5 + $0x284] ss:$16 sps:$4 sm:$0xff]   ;;  %v2895_v15 = vld [vmem:[#allocation5 + $0x280] ss:$16 sps:$4 sm:$0xff]   ;;  %v2973_v7 = vld [vmem:[#allocation5 + $0x2ec] ss:$16 sps:$4 sm:$0xff]  }
  0x57   :  { %955 = vmatprep.subr.bf16.mxu1 %v2886_v9  ;;  %v2896_v16 = vld [vmem:[#allocation5 + $0x64] ss:$16 sps:$4 sm:$0xff]   ;;  %v2900_v18 = vld [vmem:[#allocation5 + $0x60] ss:$16 sps:$4 sm:$0xff]  }
  0x58   :  { %v2898_v17 = vld [vmem:[#allocation5 + $0x264] ss:$16 sps:$4 sm:$0xff]   ;;  %v2901_v19 = vld [vmem:[#allocation5 + $0x260] ss:$16 sps:$4 sm:$0xff]  }
  0x59   :  { %915 = vmatpush1.bf16.msra.mxu0 %v2888_v10  ;;  %v2902_v20 = vld [vmem:[#allocation5 + $0x44] ss:$16 sps:$4 sm:$0xff]   ;;  %v2906_v22 = vld [vmem:[#allocation5 + $0x40] ss:$16 sps:$4 sm:$0xff]   ;;  %v2968_v10 = vld [vmem:[#allocation5 + $0xe8] ss:$16 sps:$4 sm:$0xff]  }
  0x5a   :  { %956 = vmatpush1.bf16.msra.mxu1 %v2889_v11  ;;  %916 = vmatprep.subr.bf16.mxu0 %v2890_v12  ;;  %v2904_v21 = vld [vmem:[#allocation5 + $0x244] ss:$16 sps:$4 sm:$0xff]   ;;  %v2907_v23 = vld [vmem:[#allocation5 + $0x240] ss:$16 sps:$4 sm:$0xff]   ;;  %v2971_v11 = vld [vmem:[#allocation5 + $0x2e8] ss:$16 sps:$4 sm:$0xff]  }
  0x5b   :  { %957 = vmatprep.subr.bf16.mxu1 %v2892_v13  ;;  %v2908_v24 = vld [vmem:[#allocation5 + $0x24] ss:$16 sps:$4 sm:$0xff]   ;;  %v2912_v26 = vld [vmem:[#allocation5 + $0x20] ss:$16 sps:$4 sm:$0xff]   ;;  %v2976_v12 = vld [vmem:[#allocation5 + $0xcc] ss:$16 sps:$4 sm:$0xff]  }
  0x5c   :  { %v2910_v25 = vld [vmem:[#allocation5 + $0x224] ss:$16 sps:$4 sm:$0xff]   ;;  %v2913_v27 = vld [vmem:[#allocation5 + $0x220] ss:$16 sps:$4 sm:$0xff]   ;;  %v2979_v13 = vld [vmem:[#allocation5 + $0x2cc] ss:$16 sps:$4 sm:$0xff]  }
  0x5d   :  { %917 = vmatpush1.bf16.msra.mxu0 %v2894_v14  ;;  %v2914_v28 = vld [vmem:[#allocation5 + $0x4] ss:$16 sps:$4 sm:$0xff]   ;;  %v2918_v30 = vld [vmem:[#allocation5] ss:$16 sps:$4 sm:$0xff]   ;;  %v2974_v14 = vld [vmem:[#allocation5 + $0xc8] ss:$16 sps:$4 sm:$0xff]  }
  0x5e   :  { %958 = vmatpush1.bf16.msra.mxu1 %v2895_v15  ;;  %918 = vmatprep.subr.bf16.mxu0 %v2896_v16  ;;  %v2916_v29 = vld [vmem:[#allocation5 + $0x204] ss:$16 sps:$4 sm:$0xff]   ;;  %v2919_v31 = vld [vmem:[#allocation5 + $0x200] ss:$16 sps:$4 sm:$0xff]   ;;  %v2977_v15 = vld [vmem:[#allocation5 + $0x2c8] ss:$16 sps:$4 sm:$0xff]  }
  0x5f   :  { %959 = vmatprep.subr.bf16.mxu1 %v2898_v17  ;;  %v2920_v32 = vld [vmem:[#allocation5 + $0x1e4] ss:$16 sps:$4 sm:$0xff]   ;;  %v2924_v34 = vld [vmem:[#allocation5 + $0x1e0] ss:$16 sps:$4 sm:$0xff]   ;;  %v2982_v16 = vld [vmem:[#allocation5 + $0xac] ss:$16 sps:$4 sm:$0xff]  }
  0x60   :  { %v2922_v33 = vld [vmem:[#allocation5 + $0x3e4] ss:$16 sps:$4 sm:$0xff]   ;;  %v2925_v35 = vld [vmem:[#allocation5 + $0x3e0] ss:$16 sps:$4 sm:$0xff]   ;;  %v2985_v17 = vld [vmem:[#allocation5 + $0x2ac] ss:$16 sps:$4 sm:$0xff]  }
  0x61   :  { %919 = vmatpush1.bf16.msra.mxu0 %v2900_v18  ;;  %v2926_v36 = vld [vmem:[#allocation5 + $0x1c4] ss:$16 sps:$4 sm:$0xff]   ;;  %v2930_v38 = vld [vmem:[#allocation5 + $0x1c0] ss:$16 sps:$4 sm:$0xff]   ;;  %v2980_v18 = vld [vmem:[#allocation5 + $0xa8] ss:$16 sps:$4 sm:$0xff]  }
  0x62   :  { %960 = vmatpush1.bf16.msra.mxu1 %v2901_v19  ;;  %920 = vmatprep.subr.bf16.mxu0 %v2902_v20  ;;  %v2928_v37 = vld [vmem:[#allocation5 + $0x3c4] ss:$16 sps:$4 sm:$0xff]   ;;  %v2931_v39 = vld [vmem:[#allocation5 + $0x3c0] ss:$16 sps:$4 sm:$0xff]   ;;  %v2983_v19 = vld [vmem:[#allocation5 + $0x2a8] ss:$16 sps:$4 sm:$0xff]  }
  0x63   :  { %961 = vmatprep.subr.bf16.mxu1 %v2904_v21  ;;  %v2932_v40 = vld [vmem:[#allocation5 + $0x1a4] ss:$16 sps:$4 sm:$0xff]   ;;  %v2936_v42 = vld [vmem:[#allocation5 + $0x1a0] ss:$16 sps:$4 sm:$0xff]   ;;  %v2988_v20 = vld [vmem:[#allocation5 + $0x8c] ss:$16 sps:$4 sm:$0xff]  }
  0x64   :  { %v2934_v41 = vld [vmem:[#allocation5 + $0x3a4] ss:$16 sps:$4 sm:$0xff]   ;;  %v2937_v43 = vld [vmem:[#allocation5 + $0x3a0] ss:$16 sps:$4 sm:$0xff]   ;;  %v2991_v21 = vld [vmem:[#allocation5 + $0x28c] ss:$16 sps:$4 sm:$0xff]  }
  0x65   :  { %921 = vmatpush1.bf16.msra.mxu0 %v2906_v22  ;;  %v2938_v44 = vld [vmem:[#allocation5 + $0x184] ss:$16 sps:$4 sm:$0xff]   ;;  %v2942_v47 = vld [vmem:[#allocation5 + $0x180] ss:$16 sps:$4 sm:$0xff]   ;;  %v2986_v22 = vld [vmem:[#allocation5 + $0x88] ss:$16 sps:$4 sm:$0xff]  }
  0x66   :  { %962 = vmatpush1.bf16.msra.mxu1 %v2907_v23  ;;  %922 = vmatprep.subr.bf16.mxu0 %v2908_v24  ;;  %v2940_v45 = vld [vmem:[#allocation5 + $0x384] ss:$16 sps:$4 sm:$0xff]   ;;  %v2943_v48 = vld [vmem:[#allocation5 + $0x380] ss:$16 sps:$4 sm:$0xff]   ;;  %v2989_v23 = vld [vmem:[#allocation5 + $0x288] ss:$16 sps:$4 sm:$0xff]  }
  0x67   :  { %963 = vmatprep.subr.bf16.mxu1 %v2910_v25  ;;  %v2944_v51 = vld [vmem:[#allocation5 + $0x164] ss:$16 sps:$4 sm:$0xff]   ;;  %v2948_v54 = vld [vmem:[#allocation5 + $0x160] ss:$16 sps:$4 sm:$0xff]   ;;  %v2994_v24 = vld [vmem:[#allocation5 + $0x6c] ss:$16 sps:$4 sm:$0xff]  }
  0x68   :  { %v2946_v53 = vld [vmem:[#allocation5 + $0x364] ss:$16 sps:$4 sm:$0xff]   ;;  %v2949_v55 = vld [vmem:[#allocation5 + $0x360] ss:$16 sps:$4 sm:$0xff]   ;;  %v2997_v25 = vld [vmem:[#allocation5 + $0x26c] ss:$16 sps:$4 sm:$0xff]  }
  0x69   :  { %923 = vmatpush1.bf16.msra.mxu0 %v2912_v26  ;;  %v2950_v56 = vld [vmem:[#allocation5 + $0x144] ss:$16 sps:$4 sm:$0xff]   ;;  %v2954_v58 = vld [vmem:[#allocation5 + $0x140] ss:$16 sps:$4 sm:$0xff]   ;;  %v2992_v26 = vld [vmem:[#allocation5 + $0x68] ss:$16 sps:$4 sm:$0xff]  }
  0x6a   :  { %964 = vmatpush1.bf16.msra.mxu1 %v2913_v27  ;;  %924 = vmatprep.subr.bf16.mxu0 %v2914_v28  ;;  %v2952_v57 = vld [vmem:[#allocation5 + $0x344] ss:$16 sps:$4 sm:$0xff]   ;;  %v2955_v59 = vld [vmem:[#allocation5 + $0x340] ss:$16 sps:$4 sm:$0xff]   ;;  %v2995_v27 = vld [vmem:[#allocation5 + $0x268] ss:$16 sps:$4 sm:$0xff]  }
  0x6b   :  { %965 = vmatprep.subr.bf16.mxu1 %v2916_v29  ;;  %v2956_v60 = vld [vmem:[#allocation5 + $0x124] ss:$16 sps:$4 sm:$0xff]   ;;  %v2960_v62 = vld [vmem:[#allocation5 + $0x120] ss:$16 sps:$4 sm:$0xff]   ;;  %v3000_v28 = vld [vmem:[#allocation5 + $0x4c] ss:$16 sps:$4 sm:$0xff]  }
  0x6c   :  { %v2958_v61 = vld [vmem:[#allocation5 + $0x324] ss:$16 sps:$4 sm:$0xff]   ;;  %v2961_v63 = vld [vmem:[#allocation5 + $0x320] ss:$16 sps:$4 sm:$0xff]   ;;  %v3003_v29 = vld [vmem:[#allocation5 + $0x24c] ss:$16 sps:$4 sm:$0xff]  }
  0x6d   :  { %925 = vmatpush1.bf16.msra.mxu0 %v2918_v30  ;;  %v2962_v0 = vld [vmem:[#allocation5 + $0x104] ss:$16 sps:$4 sm:$0xff]   ;;  %v2966_v2 = vld [vmem:[#allocation5 + $0x100] ss:$16 sps:$4 sm:$0xff]   ;;  %v2998_v30 = vld [vmem:[#allocation5 + $0x48] ss:$16 sps:$4 sm:$0xff]  }
  0x6e   :  { %966 = vmatpush1.bf16.msra.mxu1 %v2919_v31  ;;  %926 = vmatprep.subr.bf16.mxu0 %v2920_v32  ;;  %v2964_v1 = vld [vmem:[#allocation5 + $0x304] ss:$16 sps:$4 sm:$0xff]   ;;  %v2967_v3 = vld [vmem:[#allocation5 + $0x300] ss:$16 sps:$4 sm:$0xff]   ;;  %v3001_v31 = vld [vmem:[#allocation5 + $0x248] ss:$16 sps:$4 sm:$0xff]  }
  0x6f   :  { %967 = vmatprep.subr.bf16.mxu1 %v2922_v33  ;;  %v112_v4 = vld [vmem:[#allocation2] sm:$0xff]  ;;  %v114_v5 = vld [vmem:[#allocation2 + $0x10] sm:$0xff]  ;;  %v3006_v32 = vld [vmem:[#allocation5 + $0x2c] ss:$16 sps:$4 sm:$0xff]  }
  0x70   :  { %v3521_v8 = vpack.c.bf16 %v112_v4, %v112_v4  ;;  %v3523_v9 = vpack.c.bf16 %v114_v5, %v114_v5  ;;  %v3009_v33 = vld [vmem:[#allocation5 + $0x22c] ss:$16 sps:$4 sm:$0xff]  }
  0x71   :  { %927 = vmatpush2.bf16.msra.mxu0 %v2924_v34  ;;  %v3004_v34 = vld [vmem:[#allocation5 + $0x28] ss:$16 sps:$4 sm:$0xff]   ;;  %v3060_v4 = vld [vmem:[#allocation5 + $0x10c] ss:$16 sps:$4 sm:$0xff]  }
  0x72   :  { %968 = vmatpush2.bf16.msra.mxu1 %v2925_v35  ;;  %928 = vmatprep.subr.bf16.mxu0 %v2926_v36  ;;  %v3007_v35 = vld [vmem:[#allocation5 + $0x228] ss:$16 sps:$4 sm:$0xff]   ;;  %v3012_v36 = vld [vmem:[#allocation5 + $0xc] ss:$16 sps:$4 sm:$0xff]  }
  0x73   :  { %969 = vmatprep.subr.bf16.mxu1 %v2928_v37  ;;  %v3015_v37 = vld [vmem:[#allocation5 + $0x20c] ss:$16 sps:$4 sm:$0xff]  }
  0x74   :  { %v3063_v5 = vld [vmem:[#allocation5 + $0x30c] ss:$16 sps:$4 sm:$0xff]  }
  0x75   :  { %929 = vmatpush2.bf16.msra.mxu0 %v2930_v38  ;;  %v3010_v38 = vld [vmem:[#allocation5 + $0x8] ss:$16 sps:$4 sm:$0xff]  }
  0x76   :  { %970 = vmatpush2.bf16.msra.mxu1 %v2931_v39  ;;  %930 = vmatprep.subr.bf16.mxu0 %v2932_v40  ;;  %v3013_v39 = vld [vmem:[#allocation5 + $0x208] ss:$16 sps:$4 sm:$0xff]   ;;  %v3018_v40 = vld [vmem:[#allocation5 + $0x1ec] ss:$16 sps:$4 sm:$0xff]  }
  0x77   :  { %971 = vmatprep.subr.bf16.mxu1 %v2934_v41  ;;  %v3021_v41 = vld [vmem:[#allocation5 + $0x3ec] ss:$16 sps:$4 sm:$0xff]  }
  0x79   :  { %931 = vmatpush2.bf16.msra.mxu0 %v2936_v42  ;;  %v3016_v42 = vld [vmem:[#allocation5 + $0x1e8] ss:$16 sps:$4 sm:$0xff]  }
  0x7a   :  { %972 = vmatpush2.bf16.msra.mxu1 %v2937_v43  ;;  %932 = vmatprep.subr.bf16.mxu0 %v2938_v44  ;;  %v3019_v43 = vld [vmem:[#allocation5 + $0x3e8] ss:$16 sps:$4 sm:$0xff]   ;;  %v3024_v44 = vld [vmem:[#allocation5 + $0x1cc] ss:$16 sps:$4 sm:$0xff]  }
  0x7b   :  { %973 = vmatprep.subr.bf16.mxu1 %v2940_v45  ;;  %v3027_v45 = vld [vmem:[#allocation5 + $0x3cc] ss:$16 sps:$4 sm:$0xff]  }
  0x7d   :  { %933 = vmatpush2.bf16.msra.mxu0 %v2942_v47  ;;  %v3025_v47 = vld [vmem:[#allocation5 + $0x3c8] ss:$16 sps:$4 sm:$0xff]  }
  0x7e   :  { %974 = vmatpush2.bf16.msra.mxu1 %v2943_v48  ;;  %934 = vmatprep.subr.bf16.mxu0 %v2944_v51  ;;  %v3030_v48 = vld [vmem:[#allocation5 + $0x1ac] ss:$16 sps:$4 sm:$0xff]   ;;  %v3031_v51 = vld [vmem:[#allocation5 + $0x3a8] ss:$16 sps:$4 sm:$0xff]  }
  0x7f   :  { %975 = vmatprep.subr.bf16.mxu1 %v2946_v53  ;;  %v3039_v53 = vld [vmem:[#allocation5 + $0x38c] ss:$16 sps:$4 sm:$0xff]  }
  0x81   :  { %935 = vmatpush2.bf16.msra.mxu0 %v2948_v54  ;;  %v3034_v54 = vld [vmem:[#allocation5 + $0x188] ss:$16 sps:$4 sm:$0xff]  }
  0x82   :  { %976 = vmatpush2.bf16.msra.mxu1 %v2949_v55  ;;  %936 = vmatprep.subr.bf16.mxu0 %v2950_v56  ;;  %v3037_v55 = vld [vmem:[#allocation5 + $0x388] ss:$16 sps:$4 sm:$0xff]   ;;  %v3042_v56 = vld [vmem:[#allocation5 + $0x16c] ss:$16 sps:$4 sm:$0xff]  }
  0x83   :  { %977 = vmatprep.subr.bf16.mxu1 %v2952_v57  ;;  %v3045_v57 = vld [vmem:[#allocation5 + $0x36c] ss:$16 sps:$4 sm:$0xff]  }
  0x85   :  { %937 = vmatpush2.bf16.msra.mxu0 %v2954_v58  ;;  %v3040_v58 = vld [vmem:[#allocation5 + $0x168] ss:$16 sps:$4 sm:$0xff]  }
  0x86   :  { %978 = vmatpush2.bf16.msra.mxu1 %v2955_v59  ;;  %938 = vmatprep.subr.bf16.mxu0 %v2956_v60  ;;  %v3043_v59 = vld [vmem:[#allocation5 + $0x368] ss:$16 sps:$4 sm:$0xff]   ;;  %v3048_v60 = vld [vmem:[#allocation5 + $0x14c] ss:$16 sps:$4 sm:$0xff]  }
  0x87   :  { %979 = vmatprep.subr.bf16.mxu1 %v2958_v61  ;;  %v3051_v61 = vld [vmem:[#allocation5 + $0x34c] ss:$16 sps:$4 sm:$0xff]  }
  0x89   :  { %939 = vmatpush2.bf16.msra.mxu0 %v2960_v62  ;;  %v3046_v62 = vld [vmem:[#allocation5 + $0x148] ss:$16 sps:$4 sm:$0xff]  }
  0x8a   :  { %980 = vmatpush2.bf16.msra.mxu1 %v2961_v63  ;;  %940 = vmatprep.subr.bf16.mxu0 %v2962_v0  ;;  %v3049_v63 = vld [vmem:[#allocation5 + $0x348] ss:$16 sps:$4 sm:$0xff]   ;;  %v3054_v0 = vld [vmem:[#allocation5 + $0x12c] ss:$16 sps:$4 sm:$0xff]  }
  0x8b   :  { %981 = vmatprep.subr.bf16.mxu1 %v2964_v1  ;;  %v3057_v1 = vld [vmem:[#allocation5 + $0x32c] ss:$16 sps:$4 sm:$0xff]  }
  0x8d   :  { %941 = vmatpush2.bf16.msra.mxu0 %v2966_v2  ;;  %v3052_v2 = vld [vmem:[#allocation5 + $0x128] ss:$16 sps:$4 sm:$0xff]  }
  0x8e   :  { %982 = vmatpush2.bf16.msra.mxu1 %v2967_v3  ;;  %992 = vmatprep.subr.bf16.mxu0 %v2970_v6  ;;  %v3055_v3 = vld [vmem:[#allocation5 + $0x328] ss:$16 sps:$4 sm:$0xff]  }
  0x8f   :  { %1033 = vmatprep.subr.bf16.mxu1 %v2973_v7  ;;  %v3058_v6 = vld [vmem:[#allocation5 + $0x108] ss:$16 sps:$4 sm:$0xff]  }
  0x90   :  { %943 = vmatmul.mubr.bf16.vlgmr.msra.gmra.mxu0 %v3521_v8  ;;  %v3061_v7 = vld [vmem:[#allocation5 + $0x308] ss:$16 sps:$4 sm:$0xff]  }
  0x91   :  { %984 = vmatmul.mubr.bf16.vlgmr.msra.gmra.mxu1 %v3523_v9  ;;  %993 = vmatpush1.bf16.msra.mxu0 %v2968_v10  ;;  %v3066_v10 = vld [vmem:[#allocation8 + $0xac] ss:$12 sps:$4 sm:$0xff]  }
  0x92   :  { %1034 = vmatpush1.bf16.msra.mxu1 %v2971_v11  ;;  %994 = vmatprep.subr.bf16.mxu0 %v2976_v12  ;;  %v3064_v11 = vld [vmem:[#allocation8 + $0xa8] ss:$12 sps:$4 sm:$0xff]  }
  0x93   :  { %1035 = vmatprep.subr.bf16.mxu1 %v2979_v13  ;;  %1024 = vmatprep.mubr.bf16.mxu0 %v3518_v49  ;;  %v3033_v49 = vld [vmem:[#allocation5 + $0x3ac] ss:$16 sps:$4 sm:$0xff]   ;;  %v3069_v12 = vld [vmem:[#allocation8 + $0x94] ss:$12 sps:$4 sm:$0xff]   ;;  %v3067_v13 = vld [vmem:[#allocation8 + $0x90] ss:$12 sps:$4 sm:$0xff]  }
  0x94   :  { %1065 = vmatprep.mubr.bf16.mxu1 %v119_v52  ;;  %v3036_v52 = vld [vmem:[#allocation5 + $0x18c] ss:$16 sps:$4 sm:$0xff]  }
  0x95   :  { %995 = vmatpush1.bf16.msra.mxu0 %v2974_v14  ;;  %v3072_v14 = vld [vmem:[#allocation8 + $0x7c] ss:$12 sps:$4 sm:$0xff]  }
  0x96   :  { %1036 = vmatpush1.bf16.msra.mxu1 %v2977_v15  ;;  %996 = vmatprep.subr.bf16.mxu0 %v2982_v16  ;;  %v3070_v15 = vld [vmem:[#allocation8 + $0x78] ss:$12 sps:$4 sm:$0xff]  }
  0x97   :  { %1037 = vmatprep.subr.bf16.mxu1 %v2985_v17  ;;  %v3075_v16 = vld [vmem:[#allocation8 + $0x64] ss:$12 sps:$4 sm:$0xff]   ;;  %v3073_v17 = vld [vmem:[#allocation8 + $0x60] ss:$12 sps:$4 sm:$0xff]  }
  0x99   :  { %997 = vmatpush1.bf16.msra.mxu0 %v2980_v18  ;;  %v3114_v18 = vld [vmem:[#allocation8 + $0x22c] ss:$12 sps:$4 sm:$0xff]  }
  0x9a   :  { %1038 = vmatpush1.bf16.msra.mxu1 %v2983_v19  ;;  %998 = vmatprep.subr.bf16.mxu0 %v2988_v20  ;;  %v3078_v19 = vld [vmem:[#allocation8 + $0x4c] ss:$12 sps:$4 sm:$0xff]   ;;  %v3112_v20 = vld [vmem:[#allocation8 + $0x228] ss:$12 sps:$4 sm:$0xff]  }
  0x9b   :  { %1039 = vmatprep.subr.bf16.mxu1 %v2991_v21  ;;  %v3117_v21 = vld [vmem:[#allocation8 + $0x210] ss:$12 sps:$4 sm:$0xff]  }
  0x9d   :  { %999 = vmatpush1.bf16.msra.mxu0 %v2986_v22  ;;  %v3081_v22 = vld [vmem:[#allocation8 + $0x34] ss:$12 sps:$4 sm:$0xff]  }
  0x9e   :  { %1040 = vmatpush1.bf16.msra.mxu1 %v2989_v23  ;;  %1000 = vmatprep.subr.bf16.mxu0 %v2994_v24  ;;  %v3079_v23 = vld [vmem:[#allocation8 + $0x30] ss:$12 sps:$4 sm:$0xff]   ;;  %v3122_v24 = vld [vmem:[#allocation8 + $0x1f8] ss:$12 sps:$4 sm:$0xff]  }
  0x9f   :  { %1041 = vmatprep.subr.bf16.mxu1 %v2997_v25  ;;  %v3124_v25 = vld [vmem:[#allocation8 + $0x1fc] ss:$12 sps:$4 sm:$0xff]  }
  0xa1   :  { %1001 = vmatpush1.bf16.msra.mxu0 %v2992_v26  ;;  %v3084_v26 = vld [vmem:[#allocation8 + $0x1c] ss:$12 sps:$4 sm:$0xff]  }
  0xa2   :  { %1042 = vmatpush1.bf16.msra.mxu1 %v2995_v27  ;;  %1002 = vmatprep.subr.bf16.mxu0 %v3000_v28  ;;  %v3082_v27 = vld [vmem:[#allocation8 + $0x18] ss:$12 sps:$4 sm:$0xff]   ;;  %v3127_v28 = vld [vmem:[#allocation8 + $0x1e0] ss:$12 sps:$4 sm:$0xff]  }
  0xa3   :  { %1043 = vmatprep.subr.bf16.mxu1 %v3003_v29  ;;  %v3129_v29 = vld [vmem:[#allocation8 + $0x1e4] ss:$12 sps:$4 sm:$0xff]  }
  0xa5   :  { %1003 = vmatpush1.bf16.msra.mxu0 %v2998_v30  ;;  %v3087_v30 = vld [vmem:[#allocation8 + $0x4] ss:$12 sps:$4 sm:$0xff]  }
  0xa6   :  { %1044 = vmatpush1.bf16.msra.mxu1 %v3001_v31  ;;  %1004 = vmatprep.subr.bf16.mxu0 %v3006_v32  ;;  %v3085_v31 = vld [vmem:[#allocation8] ss:$12 sps:$4 sm:$0xff]   ;;  %v3132_v32 = vld [vmem:[#allocation8 + $0x1c8] ss:$12 sps:$4 sm:$0xff]  }
  0xa7   :  { %1045 = vmatprep.subr.bf16.mxu1 %v3009_v33  ;;  %v3134_v33 = vld [vmem:[#allocation8 + $0x1cc] ss:$12 sps:$4 sm:$0xff]  }
  0xa9   :  { %1005 = vmatpush1.bf16.msra.mxu0 %v3004_v34  ;;  %v3090_v34 = vld [vmem:[#allocation8 + $0x16c] ss:$12 sps:$4 sm:$0xff]  }
  0xaa   :  { %1046 = vmatpush1.bf16.msra.mxu1 %v3007_v35  ;;  %1006 = vmatprep.subr.bf16.mxu0 %v3012_v36  ;;  %v3088_v35 = vld [vmem:[#allocation8 + $0x168] ss:$12 sps:$4 sm:$0xff]   ;;  %v3137_v36 = vld [vmem:[#allocation8 + $0x1b0] ss:$12 sps:$4 sm:$0xff]  }
  0xab   :  { %1047 = vmatprep.subr.bf16.mxu1 %v3015_v37  ;;  %v3139_v37 = vld [vmem:[#allocation8 + $0x1b4] ss:$12 sps:$4 sm:$0xff]  }
  0xad   :  { %1007 = vmatpush1.bf16.msra.mxu0 %v3010_v38  ;;  %v3093_v38 = vld [vmem:[#allocation8 + $0x154] ss:$12 sps:$4 sm:$0xff]  }
  0xae   :  { %1048 = vmatpush1.bf16.msra.mxu1 %v3013_v39  ;;  %1008 = vmatprep.subr.bf16.mxu0 %v3018_v40  ;;  %v3091_v39 = vld [vmem:[#allocation8 + $0x150] ss:$12 sps:$4 sm:$0xff]   ;;  %v3142_v40 = vld [vmem:[#allocation8 + $0x198] ss:$12 sps:$4 sm:$0xff]  }
  0xaf   :  { %1049 = vmatprep.subr.bf16.mxu1 %v3021_v41  ;;  %v3144_v41 = vld [vmem:[#allocation8 + $0x19c] ss:$12 sps:$4 sm:$0xff]  }
  0xb1   :  { %1009 = vmatpush2.bf16.msra.mxu0 %v3016_v42  ;;  %v3096_v42 = vld [vmem:[#allocation8 + $0x13c] ss:$12 sps:$4 sm:$0xff]  }
  0xb2   :  { %1050 = vmatpush2.bf16.msra.mxu1 %v3019_v43  ;;  %1010 = vmatprep.subr.bf16.mxu0 %v3024_v44  ;;  %v3094_v43 = vld [vmem:[#allocation8 + $0x138] ss:$12 sps:$4 sm:$0xff]   ;;  %v3147_v44 = vld [vmem:[#allocation8 + $0x180] ss:$12 sps:$4 sm:$0xff]  }
  0xb3   :  { %1051 = vmatprep.subr.bf16.mxu1 %v3027_v45  ;;  %v3149_v45 = vld [vmem:[#allocation8 + $0x184] ss:$12 sps:$4 sm:$0xff]  }
  0xb5   :  { %1011 = vmatpush2.bf16.msra.mxu0 %v3022_v46  ;;  %v3099_v46 = vld [vmem:[#allocation8 + $0x124] ss:$12 sps:$4 sm:$0xff]  }
  0xb6   :  { %1052 = vmatpush2.bf16.msra.mxu1 %v3025_v47  ;;  %1012 = vmatprep.subr.bf16.mxu0 %v3030_v48  ;;  %v3097_v47 = vld [vmem:[#allocation8 + $0x120] ss:$12 sps:$4 sm:$0xff]  }
  0xb7   :  { %1053 = vmatprep.subr.bf16.mxu1 %v3033_v49  ;;  %v3102_v48 = vld [vmem:[#allocation8 + $0x10c] ss:$12 sps:$4 sm:$0xff]   ;;  %v3152_v49 = vld [vmem:[#allocation8 + $0x2e8] ss:$12 sps:$4 sm:$0xff]  }
  0xb9   :  { %1013 = vmatpush2.bf16.msra.mxu0 %v3028_v50  ;;  %v3154_v50 = vld [vmem:[#allocation8 + $0x2ec] ss:$12 sps:$4 sm:$0xff]  }
  0xba   :  { %1054 = vmatpush2.bf16.msra.mxu1 %v3031_v51  ;;  %1014 = vmatprep.subr.bf16.mxu0 %v3036_v52  ;;  %v3155_v51 = vld [vmem:[#allocation8 + $0x2d0] ss:$12 sps:$4 sm:$0xff]   ;;  %v3157_v52 = vld [vmem:[#allocation8 + $0x2d4] ss:$12 sps:$4 sm:$0xff]  }
  0xbb   :  { %1055 = vmatprep.subr.bf16.mxu1 %v3039_v53  ;;  %v3100_v53 = vld [vmem:[#allocation8 + $0x108] ss:$12 sps:$4 sm:$0xff]  }
  0xbd   :  { %1015 = vmatpush2.bf16.msra.mxu0 %v3034_v54  ;;  %v3160_v54 = vld [vmem:[#allocation8 + $0x2bc] ss:$12 sps:$4 sm:$0xff]  }
  0xbe   :  { %1056 = vmatpush2.bf16.msra.mxu1 %v3037_v55  ;;  %1016 = vmatprep.subr.bf16.mxu0 %v3042_v56  ;;  %v3105_v55 = vld [vmem:[#allocation8 + $0xf4] ss:$12 sps:$4 sm:$0xff]   ;;  %v3103_v56 = vld [vmem:[#allocation8 + $0xf0] ss:$12 sps:$4 sm:$0xff]  }
  0xbf   :  { %1057 = vmatprep.subr.bf16.mxu1 %v3045_v57  ;;  %v3158_v57 = vld [vmem:[#allocation8 + $0x2b8] ss:$12 sps:$4 sm:$0xff]  }
  0xc1   :  { %1017 = vmatpush2.bf16.msra.mxu0 %v3040_v58  ;;  %v3163_v58 = vld [vmem:[#allocation8 + $0x2a4] ss:$12 sps:$4 sm:$0xff]  }
  0xc2   :  { %1058 = vmatpush2.bf16.msra.mxu1 %v3043_v59  ;;  %1018 = vmatprep.subr.bf16.mxu0 %v3048_v60  ;;  %v3108_v59 = vld [vmem:[#allocation8 + $0xdc] ss:$12 sps:$4 sm:$0xff]   ;;  %v3161_v60 = vld [vmem:[#allocation8 + $0x2a0] ss:$12 sps:$4 sm:$0xff]  }
  0xc3   :  { %1059 = vmatprep.subr.bf16.mxu1 %v3051_v61  ;;  %v3106_v61 = vld [vmem:[#allocation8 + $0xd8] ss:$12 sps:$4 sm:$0xff]  }
  0xc5   :  { %1019 = vmatpush2.bf16.msra.mxu0 %v3046_v62  ;;  %v3166_v62 = vld [vmem:[#allocation8 + $0x28c] ss:$12 sps:$4 sm:$0xff]  }
  0xc6   :  { %1060 = vmatpush2.bf16.msra.mxu1 %v3049_v63  ;;  %1020 = vmatprep.subr.bf16.mxu0 %v3054_v0  ;;  %v3111_v63 = vld [vmem:[#allocation8 + $0xc4] ss:$12 sps:$4 sm:$0xff]   ;;  %v3164_v0 = vld [vmem:[#allocation8 + $0x288] ss:$12 sps:$4 sm:$0xff]  }
  0xc7   :  { %1061 = vmatprep.subr.bf16.mxu1 %v3057_v1  ;;  %v3109_v1 = vld [vmem:[#allocation8 + $0xc0] ss:$12 sps:$4 sm:$0xff]  }
  0xc9   :  { %1021 = vmatpush2.bf16.msra.mxu0 %v3052_v2  ;;  %v3169_v2 = vld [vmem:[#allocation8 + $0x274] ss:$12 sps:$4 sm:$0xff]  }
  0xca   :  { %1062 = vmatpush2.bf16.msra.mxu1 %v3055_v3  ;;  %1022 = vmatprep.subr.bf16.mxu0 %v3060_v4  ;;  %v3115_v3 = vld [vmem:[#allocation8 + $0x170] ss:$12 sps:$4 sm:$0xff]  }
  0xcb   :  { %1063 = vmatprep.subr.bf16.mxu1 %v3063_v5  ;;  %v3167_v4 = vld [vmem:[#allocation8 + $0x270] ss:$12 sps:$4 sm:$0xff]  }
  0xcc   :  { %v3172_v5 = vld [vmem:[#allocation8 + $0x25c] ss:$12 sps:$4 sm:$0xff]  }
  0xcd   :  { %1023 = vmatpush2.bf16.msra.mxu0 %v3058_v6  ;;  %v3170_v6 = vld [vmem:[#allocation8 + $0x258] ss:$12 sps:$4 sm:$0xff]  }
  0xce   :  { %1064 = vmatpush2.bf16.msra.mxu1 %v3061_v7  ;;  %1739 = vmatprep.subr.bf16.mxu0 %v3066_v10  ;;  %v3175_v7 = vld [vmem:[#allocation8 + $0x244] ss:$12 sps:$4 sm:$0xff]   ;;  %v3173_v10 = vld [vmem:[#allocation8 + $0x240] ss:$12 sps:$4 sm:$0xff]  }
  0xcf   :  { %1780 = vmatprep.subr.bf16.mxu1 %v3114_v18 }
  0xd0   :  { %1025 = vmatmul.mubr.bf16.vlgmr.msra.gmra.mxu0 %v3521_v8  ;;  %v3076_v8 = vld [vmem:[#allocation8 + $0x48] ss:$12 sps:$4 sm:$0xff]  }
  0xd1   :  { %1066 = vmatmul.mubr.bf16.vlgmr.msra.gmra.mxu1 %v3523_v9  ;;  %1740 = vmatpush1.bf16.msra.mxu0 %v3064_v11  ;;  %v3119_v9 = vld [vmem:[#allocation8 + $0x214] ss:$12 sps:$4 sm:$0xff]   ;;  %v3176_v11 = vld [vmem:[#allocation8 + $0x2f0] ss:$12 sps:$4 sm:$0xff]  }
  0xd2   :  { %1741 = vmatprep.subr.bf16.mxu0 %v3069_v12  ;;  %1781 = vmatpush1.bf16.msra.mxu1 %v3112_v20  ;;  %v250_v12 = vlaneseq }
  0xd3   :  { %1782 = vmatprep.subr.bf16.mxu1 %v3119_v9 }
  0xd5   :  { %1742 = vmatpush1.bf16.msra.mxu0 %v3067_v13  ;;  %v3530_v13 = vshrl.u32 %v250_v12, 7  ;;  %v3192_v12 = vld [vmem:[#allocation10 + $0x70] ss:$8 sps:$4 sm:$0xff]  }
  0xd6   :  { %1743 = vmatprep.subr.bf16.mxu0 %v3072_v14  ;;  %1783 = vmatpush1.bf16.msra.mxu1 %v3117_v21 }
  0xd7   :  { %1784 = vmatprep.subr.bf16.mxu1 %v3124_v25  ;;  %v3533_v14 = vsub.s32 0, %v3530_v13 }
  0xd9   :  { %1744 = vmatpush1.bf16.msra.mxu0 %v3070_v15  ;;  %v248_v15 = vld [vmem:[#allocation7] sm:$0xf] }
  0xda   :  { %1745 = vmatprep.subr.bf16.mxu0 %v3075_v16  ;;  %1785 = vmatpush1.bf16.msra.mxu1 %v3122_v24  ;;  %v3536_v16 = vsub.s32 1, %v3530_v13 }
  0xdb   :  { %1786 = vmatprep.subr.bf16.mxu1 %v3129_v29 }
  0xdc   :  { %v257_v18 = vrot.slane %v248_v15, %v3536_v16 }
  0xdd   :  { %1746 = vmatpush1.bf16.msra.mxu0 %v3073_v17  ;;  %v253_v17 = vrot.slane %v248_v15, %v3533_v14 }
  0xde   :  { %1747 = vmatprep.subr.bf16.mxu0 %v3078_v19  ;;  %1787 = vmatpush1.bf16.msra.mxu1 %v3127_v28 }
  0xdf   :  { %1788 = vmatprep.subr.bf16.mxu1 %v3134_v33 }
  0xe1   :  { %1748 = vmatpush1.bf16.msra.mxu0 %v3076_v8 }
  0xe2   :  { %1749 = vmatprep.subr.bf16.mxu0 %v3081_v22  ;;  %1789 = vmatpush1.bf16.msra.mxu1 %v3132_v32  ;;  %v3116_v32 = vld [vmem:[#allocation8 + $0xb0] ss:$12 sps:$4 sm:$0xff]  }
  0xe3   :  { %1790 = vmatprep.subr.bf16.mxu1 %v3139_v37  ;;  %v3126_v37 = vld [vmem:[#allocation8 + $0x80] ss:$12 sps:$4 sm:$0xff]  }
  0xe5   :  { %1750 = vmatpush1.bf16.msra.mxu0 %v3079_v23 }
  0xe6   :  { %1751 = vmatprep.subr.bf16.mxu0 %v3084_v26  ;;  %1791 = vmatpush1.bf16.msra.mxu1 %v3137_v36  ;;  %v3125_v36 = vld [vmem:[#allocation8 + $0x140] ss:$12 sps:$4 sm:$0xff]  }
  0xe7   :  { %1792 = vmatprep.subr.bf16.mxu1 %v3144_v41  ;;  %v3136_v41 = vld [vmem:[#allocation8 + $0x50] ss:$12 sps:$4 sm:$0xff]  }
  0xe9   :  { %1752 = vmatpush1.bf16.msra.mxu0 %v3082_v27 }
  0xea   :  { %1753 = vmatprep.subr.bf16.mxu0 %v3087_v30  ;;  %1793 = vmatpush1.bf16.msra.mxu1 %v3142_v40  ;;  %v3135_v40 = vld [vmem:[#allocation8 + $0x110] ss:$12 sps:$4 sm:$0xff]  }
  0xeb   :  { %1794 = vmatprep.subr.bf16.mxu1 %v3149_v45  ;;  %v3146_v45 = vld [vmem:[#allocation8 + $0x20] ss:$12 sps:$4 sm:$0xff]  }
  0xed   :  { %1754 = vmatpush1.bf16.msra.mxu0 %v3085_v31 }
  0xee   :  { %1755 = vmatprep.subr.bf16.mxu0 %v3090_v34  ;;  %1795 = vmatpush1.bf16.msra.mxu1 %v3147_v44  ;;  %v3120_v34 = vld [vmem:[#allocation8 + $0x158] ss:$12 sps:$4 sm:$0xff]   ;;  %v3145_v44 = vld [vmem:[#allocation8 + $0xe0] ss:$12 sps:$4 sm:$0xff]  }
  0xef   :  { %1796 = vmatprep.subr.bf16.mxu1 %v3154_v50 }
  0xf1   :  { %1756 = vmatpush2.bf16.msra.mxu0 %v3088_v35  ;;  %v3121_v35 = vld [vmem:[#allocation8 + $0x98] ss:$12 sps:$4 sm:$0xff]  }
  0xf2   :  { %1757 = vmatprep.subr.bf16.mxu0 %v3093_v38  ;;  %1797 = vmatpush2.bf16.msra.mxu1 %v3152_v49  ;;  %v3130_v38 = vld [vmem:[#allocation8 + $0x128] ss:$12 sps:$4 sm:$0xff]   ;;  %v264_v49 = vsub.s32 3, %v3530_v13 }
  0xf3   :  { %1798 = vmatprep.subr.bf16.mxu1 %v3157_v52 }
  0xf5   :  { %1758 = vmatpush2.bf16.msra.mxu0 %v3091_v39  ;;  %v3131_v39 = vld [vmem:[#allocation8 + $0x68] ss:$12 sps:$4 sm:$0xff]  }
  0xf6   :  { %1759 = vmatprep.subr.bf16.mxu0 %v3096_v42  ;;  %1799 = vmatpush2.bf16.msra.mxu1 %v3155_v51  ;;  %v3140_v42 = vld [vmem:[#allocation8 + $0xf8] ss:$12 sps:$4 sm:$0xff]   ;;  %v265_v51 = vrot.slane %v248_v15, %v264_v49 }
  0xf7   :  { %1800 = vmatprep.subr.bf16.mxu1 %v3160_v54  ;;  %v3233_v49 = vld [vmem:[#allocation10 + $0xa4] ss:$8 sps:$4 sm:$0xff]  }
  0xf9   :  { %1760 = vmatpush2.bf16.msra.mxu0 %v3094_v43  ;;  %v3141_v43 = vld [vmem:[#allocation8 + $0x38] ss:$12 sps:$4 sm:$0xff]  }
  0xfa   :  { %1761 = vmatprep.subr.bf16.mxu0 %v3099_v46  ;;  %1801 = vmatpush2.bf16.msra.mxu1 %v3158_v57  ;;  %v3150_v46 = vld [vmem:[#allocation8 + $0xc8] ss:$12 sps:$4 sm:$0xff]  }
  0xfb   :  { %1802 = vmatprep.subr.bf16.mxu1 %v3163_v58 }
  0xfd   :  { %1762 = vmatpush2.bf16.msra.mxu0 %v3097_v47  ;;  %v3151_v47 = vld [vmem:[#allocation8 + $0x8] ss:$12 sps:$4 sm:$0xff]  }
  0xfe   :  { %1763 = vmatprep.subr.bf16.mxu0 %v3102_v48  ;;  %1803 = vmatpush2.bf16.msra.mxu1 %v3161_v60  ;;  %v260_v48 = vsub.s32 2, %v3530_v13  ;;  %v3268_v13 = vld [vmem:[#allocation11 + $0x68] sm:$0xff]  }
  0xff   :  { %1804 = vmatprep.subr.bf16.mxu1 %v3166_v62 }
 0x100   :  { %v261_v50 = vrot.slane %v248_v15, %v260_v48  ;;  %v3194_v15 = vld [vmem:[#allocation10 + $0x74] ss:$8 sps:$4 sm:$0xff]  }
 0x101   :  { %1764 = vmatpush2.bf16.msra.mxu0 %v3100_v53 }
 0x102   :  { %1765 = vmatprep.subr.bf16.mxu0 %v3105_v55  ;;  %1805 = vmatpush2.bf16.msra.mxu1 %v3164_v0 }
 0x103   :  { %1806 = vmatprep.subr.bf16.mxu1 %v3169_v2 }
 0x105   :  { %1766 = vmatpush2.bf16.msra.mxu0 %v3103_v56 }
 0x106   :  { %1767 = vmatprep.subr.bf16.mxu0 %v3108_v59  ;;  %1807 = vmatpush2.bf16.msra.mxu1 %v3167_v4 }
 0x107   :  { %1808 = vmatprep.subr.bf16.mxu1 %v3172_v5  ;;  %v3178_v5 = vld [vmem:[#allocation8 + $0x2d8] ss:$12 sps:$4 sm:$0xff]  }
 0x109   :  { %1768 = vmatpush2.bf16.msra.mxu0 %v3106_v61 }
 0x10a   :  { %1769 = vmatprep.subr.bf16.mxu0 %v3111_v63  ;;  %1809 = vmatpush2.bf16.msra.mxu1 %v3170_v6  ;;  %v3179_v6 = vld [vmem:[#allocation8 + $0x218] ss:$12 sps:$4 sm:$0xff]  }
 0x10b   :  { %1810 = vmatprep.subr.bf16.mxu1 %v3175_v7  ;;  %v3180_v7 = vld [vmem:[#allocation8 + $0x2c0] ss:$12 sps:$4 sm:$0xff]  }
 0x10d   :  { %1770 = vmatpush2.bf16.msra.mxu0 %v3109_v1 }
 0x10e   :  { %2790 = vmatprep.subr.bf16.mxu0 %v3115_v3  ;;  %1811 = vmatpush2.bf16.msra.mxu1 %v3173_v10  ;;  %v3177_v3 = vld [vmem:[#allocation8 + $0x230] ss:$12 sps:$4 sm:$0xff]   ;;  %v3181_v10 = vld [vmem:[#allocation8 + $0x200] ss:$12 sps:$4 sm:$0xff]  }
 0x10f   :  { %2812 = vmatprep.subr.bf16.mxu1 %v3176_v11  ;;  %v3182_v11 = vld [vmem:[#allocation8 + $0x2a8] ss:$12 sps:$4 sm:$0xff]  }
 0x150   :  { %v944_v19 = vpop.f32.mrf.mxu0 }
 0x151   :  { %v985_v20 = vpop.f32.mrf.mxu1  ;;  %v945_v8 = vadd.f32 %v944_v19, %v253_v17  ;;  %v3197_v17 = vld [vmem:[#allocation10 + $0x64] ss:$8 sps:$4 sm:$0xff]   ;;  %v3195_v19 = vld [vmem:[#allocation10 + $0x60] ss:$8 sps:$4 sm:$0xff]  }
 0x152   :  { %v946_v21 = vpop.f32.mrf.mxu0 }
 0x153   :  { %v987_v9 = vpop.f32.mrf.mxu1  ;;  %v986_v22 = vadd.f32 %v985_v20, %v945_v8  ;;  %v947_v23 = vadd.f32 %v946_v21, %v257_v18  ;;  %v3183_v18 = vld [vmem:[#allocation8 + $0x1e8] ss:$12 sps:$4 sm:$0xff]   ;;  %v3184_v20 = vld [vmem:[#allocation8 + $0x290] ss:$12 sps:$4 sm:$0xff]  }
 0x154   :  { %v948_v24 = vpop.f32.mrf.mxu0  ;;  %v3200_v8 = vld [vmem:[#allocation10 + $0x54] ss:$8 sps:$4 sm:$0xff]  }
 0x155   :  { %v989_v25 = vpop.f32.mrf.mxu1  ;;  %v988_v26 = vadd.f32 %v987_v9, %v947_v23  ;;  %v1074_v27 = vmax.f32 %v986_v22, 0.0  ;;  %v3185_v21 = vld [vmem:[#allocation8 + $0x1d0] ss:$12 sps:$4 sm:$0xff]   ;;  %v3186_v22 = vld [vmem:[#allocation8 + $0x278] ss:$12 sps:$4 sm:$0xff]  }
 0x156   :  { %v949_v28 = vpop.f32.mrf.mxu0  ;;  %v3198_v9 = vld [vmem:[#allocation10 + $0x50] ss:$8 sps:$4 sm:$0xff]   ;;  %v3203_v23 = vld [vmem:[#allocation10 + $0x44] ss:$8 sps:$4 sm:$0xff]   ;;  %v3201_v25 = vld [vmem:[#allocation10 + $0x40] ss:$8 sps:$4 sm:$0xff]  }
 0x157   :  { %v990_v29 = vpop.f32.mrf.mxu1  ;;  %v1075_v30 = vmax.f32 %v988_v26, 0.0  ;;  %v1078_v33 = vpack.c.bf16 %v1074_v27, %v1074_v27  ;;  %v3187_v24 = vld [vmem:[#allocation8 + $0x1b8] ss:$12 sps:$4 sm:$0xff]   ;;  %v3188_v26 = vld [vmem:[#allocation8 + $0x260] ss:$12 sps:$4 sm:$0xff]  }
 0x158   :  { %v3206_v27 = vld [vmem:[#allocation10 + $0x34] ss:$8 sps:$4 sm:$0xff]   ;;  %v3189_v28 = vld [vmem:[#allocation8 + $0x1a0] ss:$12 sps:$4 sm:$0xff]   ;;  %v3204_v29 = vld [vmem:[#allocation10 + $0x30] ss:$8 sps:$4 sm:$0xff]  }
 0x159   :  { %v1079_v31 = vpack.c.bf16 %v1075_v30, %v1075_v30  ;;  %v3190_v30 = vld [vmem:[#allocation8 + $0x248] ss:$12 sps:$4 sm:$0xff]  }
 0x15b   :  { %1771 = vmatprep.mubr.bf16.mxu0 %v1079_v31 }
 0x15c   :  { %1772 = vmatmul.mubr.bf16.vlgmr.msra.gmra.mxu0 %v1078_v33 }
 0x15d   :  { %2791 = vmatpush3.bf16.msra.mxu0 %v3116_v32  ;;  %1853 = vmatprep.mubr.bf16.mxu0 %v1079_v31  ;;  %v3209_v31 = vld [vmem:[#allocation10 + $0x24] ss:$8 sps:$4 sm:$0xff]   ;;  %v3191_v32 = vld [vmem:[#allocation8 + $0x188] ss:$12 sps:$4 sm:$0xff]  }
 0x15e   :  { %2792 = vmatprep.subr.bf16.mxu0 %v3120_v34  ;;  %v3212_v34 = vld [vmem:[#allocation10 + $0x14] ss:$8 sps:$4 sm:$0xff]  }
 0x161   :  { %2793 = vmatpush3.bf16.msra.mxu0 %v3121_v35  ;;  %v3210_v35 = vld [vmem:[#allocation10 + $0x10] ss:$8 sps:$4 sm:$0xff]  }
 0x162   :  { %2794 = vmatprep.subr.bf16.mxu0 %v3125_v36  ;;  %v3215_v36 = vld [vmem:[#allocation10 + $0x4] ss:$8 sps:$4 sm:$0xff]  }
 0x165   :  { %2795 = vmatpush3.bf16.msra.mxu0 %v3126_v37  ;;  %v3213_v37 = vld [vmem:[#allocation10] ss:$8 sps:$4 sm:$0xff]  }
 0x166   :  { %2796 = vmatprep.subr.bf16.mxu0 %v3130_v38  ;;  %v3218_v38 = vld [vmem:[#allocation10 + $0xf4] ss:$8 sps:$4 sm:$0xff]  }
 0x169   :  { %2797 = vmatpush3.bf16.msra.mxu0 %v3131_v39  ;;  %v3216_v39 = vld [vmem:[#allocation10 + $0xf0] ss:$8 sps:$4 sm:$0xff]  }
 0x16a   :  { %2798 = vmatprep.subr.bf16.mxu0 %v3135_v40  ;;  %v3221_v40 = vld [vmem:[#allocation10 + $0xe4] ss:$8 sps:$4 sm:$0xff]  }
 0x16d   :  { %2799 = vmatpush3.bf16.msra.mxu0 %v3136_v41  ;;  %v3219_v41 = vld [vmem:[#allocation10 + $0xe0] ss:$8 sps:$4 sm:$0xff]  }
 0x16e   :  { %2800 = vmatprep.subr.bf16.mxu0 %v3140_v42  ;;  %v3224_v42 = vld [vmem:[#allocation10 + $0xd4] ss:$8 sps:$4 sm:$0xff]  }
 0x171   :  { %2801 = vmatpush3.bf16.msra.mxu0 %v3141_v43  ;;  %v3222_v43 = vld [vmem:[#allocation10 + $0xd0] ss:$8 sps:$4 sm:$0xff]  }
 0x172   :  { %2802 = vmatprep.subr.bf16.mxu0 %v3145_v44  ;;  %v3227_v44 = vld [vmem:[#allocation10 + $0xc4] ss:$8 sps:$4 sm:$0xff]  }
 0x175   :  { %2803 = vmatpush3.bf16.msra.mxu0 %v3146_v45  ;;  %v3225_v45 = vld [vmem:[#allocation10 + $0xc0] ss:$8 sps:$4 sm:$0xff]  }
 0x176   :  { %2804 = vmatprep.subr.bf16.mxu0 %v3150_v46  ;;  %v3230_v46 = vld [vmem:[#allocation10 + $0xb4] ss:$8 sps:$4 sm:$0xff]  }
 0x179   :  { %2805 = vmatpush3.bf16.msra.mxu0 %v3151_v47  ;;  %v3228_v47 = vld [vmem:[#allocation10 + $0xb0] ss:$8 sps:$4 sm:$0xff]  }
 0x17a   :  { %2207 = vmatprep.subr.bf16.mxu0 %v3194_v15 }
 0x17c   :  { %1854 = vmatmul.mubr.bf16.vlgmr.msra.gmra.mxu0 %v1078_v33  ;;  %v3207_v33 = vld [vmem:[#allocation10 + $0x20] ss:$8 sps:$4 sm:$0xff]  }
 0x17d   :  { %2208 = vmatpush1.bf16.msra.mxu0 %v3192_v12 }
 0x17e   :  { %2209 = vmatprep.subr.bf16.mxu0 %v3197_v17 }
 0x181   :  { %2210 = vmatpush1.bf16.msra.mxu0 %v3195_v19 }
 0x182   :  { %2211 = vmatprep.subr.bf16.mxu0 %v3200_v8  ;;  %v1210_v8 = vld [vmem:[%s3566_s4] sm:$0x7] }
 0x185   :  { %2212 = vmatpush1.bf16.msra.mxu0 %v3198_v9  ;;  %v1219_v9 = vrot.slane %v1210_v8, %v3536_v16 }
 0x186   :  { %2213 = vmatprep.subr.bf16.mxu0 %v3203_v23 }
 0x189   :  { %2214 = vmatpush1.bf16.msra.mxu0 %v3201_v25 }
 0x18a   :  { %2215 = vmatprep.subr.bf16.mxu0 %v3206_v27 }
 0x18d   :  { %2216 = vmatpush1.bf16.msra.mxu0 %v3204_v29 }
 0x18e   :  { %2217 = vmatprep.subr.bf16.mxu0 %v3209_v31 }
 0x190   :  { %v1026_v52 = vpop.f32.mrf.mxu0 }
 0x191   :  { %v1067_v53 = vpop.f32.mrf.mxu1  ;;  %v1027_v54 = vadd.f32 %v1026_v52, %v261_v50  ;;  %2218 = vmatpush1.bf16.msra.mxu0 %v3207_v33  ;;  %v3231_v50 = vld [vmem:[#allocation10 + $0xa0] ss:$8 sps:$4 sm:$0xff]   ;;  %v3234_v52 = vld [vmem:[#allocation10 + $0x90] ss:$8 sps:$4 sm:$0xff]  }
 0x192   :  { %v1028_v55 = vpop.f32.mrf.mxu0  ;;  %2219 = vmatprep.subr.bf16.mxu0 %v3212_v34  ;;  %v1223_v34 = vrot.slane %v1210_v8, %v260_v48  ;;  %v3269_v48 = vld [vmem:[#allocation11 + $0x28] sm:$0xff]  }
 0x193   :  { %v1069_v56 = vpop.f32.mrf.mxu1  ;;  %v1068_v57 = vadd.f32 %v1067_v53, %v1027_v54  ;;  %v1029_v58 = vadd.f32 %v1028_v55, %v265_v51  ;;  %v3236_v51 = vld [vmem:[#allocation10 + $0x94] ss:$8 sps:$4 sm:$0xff]   ;;  %v3239_v53 = vld [vmem:[#allocation10 + $0x84] ss:$8 sps:$4 sm:$0xff]   ;;  %v3237_v54 = vld [vmem:[#allocation10 + $0x80] ss:$8 sps:$4 sm:$0xff]  }
 0x194   :  { %v1030_v59 = vpop.f32.mrf.mxu0  ;;  %v3242_v55 = vld [vmem:[#allocation10 + $0x174] ss:$8 sps:$4 sm:$0xff]  }
 0x195   :  { %v1071_v60 = vpop.f32.mrf.mxu1  ;;  %v1070_v61 = vadd.f32 %v1069_v56, %v1029_v58  ;;  %v1076_v62 = vmax.f32 %v1068_v57, 0.0  ;;  %2220 = vmatpush1.bf16.msra.mxu0 %v3210_v35  ;;  %v3240_v56 = vld [vmem:[#allocation10 + $0x170] ss:$8 sps:$4 sm:$0xff]   ;;  %v3245_v57 = vld [vmem:[#allocation10 + $0x164] ss:$8 sps:$4 sm:$0xff]  }
 0x196   :  { %v1031_v63 = vpop.f32.mrf.mxu0  ;;  %2221 = vmatprep.subr.bf16.mxu0 %v3215_v36  ;;  %v3243_v58 = vld [vmem:[#allocation10 + $0x160] ss:$8 sps:$4 sm:$0xff]   ;;  %v3248_v59 = vld [vmem:[#allocation10 + $0x154] ss:$8 sps:$4 sm:$0xff]   ;;  %v3246_v60 = vld [vmem:[#allocation10 + $0x150] ss:$8 sps:$4 sm:$0xff]  }
 0x197   :  { %v1072_v0 = vpop.f32.mrf.mxu1  ;;  %v1077_v1 = vmax.f32 %v1070_v61, 0.0  ;;  %v1080_v4 = vpack.c.bf16 %v1076_v62, %v1076_v62  ;;  %v3251_v61 = vld [vmem:[#allocation10 + $0x144] ss:$8 sps:$4 sm:$0xff]   ;;  %v3249_v62 = vld [vmem:[#allocation10 + $0x140] ss:$8 sps:$4 sm:$0xff]  }
 0x198   :  { %v3254_v63 = vld [vmem:[#allocation10 + $0x134] ss:$8 sps:$4 sm:$0xff]   ;;  %v3252_v0 = vld [vmem:[#allocation10 + $0x130] ss:$8 sps:$4 sm:$0xff]  }
 0x199   :  { %v1081_v2 = vpack.c.bf16 %v1077_v1, %v1077_v1  ;;  %2222 = vmatpush1.bf16.msra.mxu0 %v3213_v37  ;;  %v3257_v1 = vld [vmem:[#allocation10 + $0x124] ss:$8 sps:$4 sm:$0xff]  }
 0x19a   :  { %2223 = vmatprep.subr.bf16.mxu0 %v3218_v38 }
 0x19b   :  { %1812 = vmatprep.mubr.bf16.mxu1 %v1081_v2 }
 0x19c   :  { %1813 = vmatmul.mubr.bf16.vlgmr.msra.gmra.mxu1 %v1080_v4 }
 0x19d   :  { %2813 = vmatpush3.bf16.msra.mxu1 %v3177_v3  ;;  %1893 = vmatprep.mubr.bf16.mxu1 %v1081_v2  ;;  %v3255_v2 = vld [vmem:[#allocation10 + $0x120] ss:$8 sps:$4 sm:$0xff]   ;;  %v3260_v3 = vld [vmem:[#allocation10 + $0x114] ss:$8 sps:$4 sm:$0xff]  }
 0x19e   :  { %2814 = vmatprep.subr.bf16.mxu1 %v3178_v5  ;;  %2224 = vmatpush2.bf16.msra.mxu0 %v3216_v39  ;;  %v3263_v5 = vld [vmem:[#allocation10 + $0x104] ss:$8 sps:$4 sm:$0xff]  }
 0x19f   :  { %2225 = vmatprep.subr.bf16.mxu0 %v3221_v40 }
 0x1a1   :  { %2815 = vmatpush3.bf16.msra.mxu1 %v3179_v6  ;;  %v3261_v6 = vld [vmem:[#allocation10 + $0x100] ss:$8 sps:$4 sm:$0xff]  }
 0x1a2   :  { %2816 = vmatprep.subr.bf16.mxu1 %v3180_v7  ;;  %2226 = vmatpush2.bf16.msra.mxu0 %v3219_v41  ;;  %v3448_v7 = vmov 0  }
 0x1a3   :  { %2227 = vmatprep.subr.bf16.mxu0 %v3224_v42 }
 0x1a5   :  { %2817 = vmatpush3.bf16.msra.mxu1 %v3181_v10 }
 0x1a6   :  { %2818 = vmatprep.subr.bf16.mxu1 %v3182_v11  ;;  %2228 = vmatpush2.bf16.msra.mxu0 %v3222_v43 }
 0x1a7   :  { %2229 = vmatprep.subr.bf16.mxu0 %v3227_v44 }
 0x1a9   :  { %2819 = vmatpush3.bf16.msra.mxu1 %v3183_v18 }
 0x1aa   :  { %2820 = vmatprep.subr.bf16.mxu1 %v3184_v20  ;;  %2230 = vmatpush2.bf16.msra.mxu0 %v3225_v45  ;;  %v3264_v45 = vld [vmem:[#allocation11 + $0x78] sm:$0xff]  }
 0x1ab   :  { %2231 = vmatprep.subr.bf16.mxu0 %v3230_v46  ;;  %v3265_v46 = vld [vmem:[#allocation11 + $0x38] sm:$0xff]  }
 0x1ad   :  { %2821 = vmatpush3.bf16.msra.mxu1 %v3185_v21  ;;  %v1215_v21 = vrot.slane %v1210_v8, %v3533_v14 }
 0x1ae   :  { %2822 = vmatprep.subr.bf16.mxu1 %v3186_v22  ;;  %2232 = vmatpush2.bf16.msra.mxu0 %v3228_v47  ;;  %v3266_v47 = vld [vmem:[#allocation11 + $0x70] sm:$0xff]  }
 0x1af   :  { %2233 = vmatprep.subr.bf16.mxu0 %v3233_v49  ;;  %v3267_v49 = vld [vmem:[#allocation11 + $0x30] sm:$0xff]  }
 0x1b1   :  { %2823 = vmatpush3.bf16.msra.mxu1 %v3187_v24 }
 0x1b2   :  { %2824 = vmatprep.subr.bf16.mxu1 %v3188_v26  ;;  %2234 = vmatpush2.bf16.msra.mxu0 %v3231_v50  ;;  %v3270_v50 = vld [vmem:[#allocation11 + $0x60] sm:$0xff]  }
 0x1b3   :  { %2235 = vmatprep.subr.bf16.mxu0 %v3236_v51  ;;  %v3271_v51 = vld [vmem:[#allocation11 + $0x20] sm:$0xff]  }
 0x1b5   :  { %2825 = vmatpush3.bf16.msra.mxu1 %v3189_v28 }
 0x1b6   :  { %2826 = vmatprep.subr.bf16.mxu1 %v3190_v30  ;;  %2236 = vmatpush2.bf16.msra.mxu0 %v3234_v52  ;;  %v3272_v52 = vld [vmem:[#allocation11 + $0x58] sm:$0xff]  }
 0x1b7   :  { %2237 = vmatprep.subr.bf16.mxu0 %v3239_v53  ;;  %v3273_v53 = vld [vmem:[#allocation11 + $0x18] sm:$0xff]  }
 0x1b9   :  { %2827 = vmatpush3.bf16.msra.mxu1 %v3191_v32 }
 0x1ba   :  { %2238 = vmatpush2.bf16.msra.mxu0 %v3237_v54  ;;  %2248 = vmatprep.subr.bf16.mxu1 %v3242_v55  ;;  %v3274_v54 = vld [vmem:[#allocation11 + $0x50] sm:$0xff]  }
 0x1bb   :  { %v3275_v55 = vld [vmem:[#allocation11 + $0x10] sm:$0xff]  }
 0x1bc   :  { %1894 = vmatmul.mubr.bf16.vlgmr.msra.gmra.mxu1 %v1080_v4  ;;  %v3258_v4 = vld [vmem:[#allocation10 + $0x110] ss:$8 sps:$4 sm:$0xff]  }
 0x1bd   :  { %2249 = vmatpush1.bf16.msra.mxu1 %v3240_v56  ;;  %2280 = vmatprep.mubr.bf16.mxu1 %v3448_v7  ;;  %v3276_v56 = vld [vmem:[#allocation11 + $0x48] sm:$0xff]  }
 0x1be   :  { %2250 = vmatprep.subr.bf16.mxu1 %v3245_v57  ;;  %v3277_v57 = vld [vmem:[#allocation11 + $0x8] sm:$0xff]  }
 0x1c1   :  { %2251 = vmatpush1.bf16.msra.mxu1 %v3243_v58  ;;  %v3278_v58 = vld [vmem:[#allocation11 + $0x40] sm:$0xff]  }
 0x1c2   :  { %2252 = vmatprep.subr.bf16.mxu1 %v3248_v59  ;;  %v3279_v59 = vld [vmem:[#allocation11] sm:$0xff]  }
 0x1c5   :  { %2253 = vmatpush1.bf16.msra.mxu1 %v3246_v60 }
 0x1c6   :  { %2254 = vmatprep.subr.bf16.mxu1 %v3251_v61 }
 0x1c9   :  { %2255 = vmatpush1.bf16.msra.mxu1 %v3249_v62 }
 0x1ca   :  { %2256 = vmatprep.subr.bf16.mxu1 %v3254_v63 }
 0x1cd   :  { %2257 = vmatpush1.bf16.msra.mxu1 %v3252_v0  ;;  %v1955_v0 = vld [vmem:[%s3568_s6] sm:$0x3] }
 0x1ce   :  { %2258 = vmatprep.subr.bf16.mxu1 %v3257_v1  ;;  %v1960_v1 = vrot.slane %v1955_v0, %v3533_v14  ;;  %v2773_v14 = vld [vmem:[%s3570_s8] ss:$0 sm:$0xff]  ;;  %s3404_s8 = scalar_lea.vmem %s2490_s25, 128 }
 0x1cf   :  { %p3405_p2 = scmp.ne.s32.totalorder %s2490_s25, %s3404_s8  ;;  %p3410_p4 = scmp.lt.s32.totalorder %s3404_s8, %s3404_s8 }
 0x1d1   :  { %2259 = vmatpush1.bf16.msra.mxu1 %v3255_v2  ;;  %v1964_v2 = vrot.slane %v1955_v0, %v3536_v16  ;;  %p3411_p5 = por %p3410_p4, %p3409_p3 }
 0x1d2   :  { %2260 = vmatprep.subr.bf16.mxu1 %v3260_v3 }
 0x1d3   :  { %p3412_p6 = pnand %p3411_p5, %p3405_p2 }
 0x1d5   :  { %2261 = vmatpush1.bf16.msra.mxu1 %v3258_v4 }
 0x1d6   :  { %2262 = vmatprep.subr.bf16.mxu1 %v3263_v5 }
 0x1d9   :  { %2263 = vmatpush1.bf16.msra.mxu1 %v3261_v6 }
 0x1da   :  { %2834 = vmatprep.subr.bf16.mxu1 %v3264_v45 }
 0x21c   :  { %v1773_v10 = vpop.f32.mrf.mxu0 }
 0x21d   :  { %v1774_v22 = vadd.f32 %v1773_v10, %v1215_v21 }
 0x21e   :  { %v1775_v11 = vpop.f32.mrf.mxu0 }
 0x21f   :  { %v1776_v24 = vadd.f32 %v1775_v11, %v1219_v9 }
 0x220   :  { %v1777_v12 = vpop.f32.mrf.mxu0 }
 0x222   :  { %v1778_v15 = vpop.f32.mrf.mxu0 }
 0x23c   :  { %v2806_v17 = vpop.f32.mrf.mxu0 }
 0x23e   :  { %v2807_v18 = vpop.f32.mrf.mxu0 }
 0x23f   :  { %v2808_v35 = vadd.f32 %v2807_v18, %v2806_v17 }
 0x240   :  { %v2809_v19 = vpop.f32.mrf.mxu0 }
 0x241   :  { %v1856_v38 = vadd.f32 %v2808_v35, %v1223_v34 }
 0x242   :  { %v2810_v20 = vpop.f32.mrf.mxu0 }
 0x25c   :  { %v1814_v23 = vpop.f32.mrf.mxu1 }
 0x25d   :  { %v1815_v25 = vadd.f32 %v1814_v23, %v1774_v22 }
 0x25e   :  { %v1816_v26 = vpop.f32.mrf.mxu1 }
 0x25f   :  { %v1817_v27 = vadd.f32 %v1816_v26, %v1776_v24  ;;  %v1901_v28 = vmax.f32 %v1815_v25, 0.0 }
 0x260   :  { %v1818_v29 = vpop.f32.mrf.mxu1 }
 0x261   :  { %v1902_v30 = vmax.f32 %v1817_v27, 0.0  ;;  %v1904_v33 = vpack.c.bf16 %v1901_v28, %v1901_v28 }
 0x262   :  { %v1819_v31 = vpop.f32.mrf.mxu1 }
 0x263   :  { %v1905_v32 = vpack.c.bf16 %v1902_v30, %v1902_v30 }
 0x265   :  { %2239 = vmatprep.mubr.bf16.mxu0 %v1905_v32 }
 0x266   :  { %2240 = vmatmul.mubr.bf16.vlgmr.msra.gmra.mxu0 %v1904_v33 }
 0x27c   :  { %v2828_v36 = vpop.f32.mrf.mxu1 }
 0x27e   :  { %v2829_v37 = vpop.f32.mrf.mxu1 }
 0x27f   :  { %v2830_v39 = vadd.f32 %v2829_v37, %v2828_v36 }
 0x280   :  { %v2831_v40 = vpop.f32.mrf.mxu1 }
 0x281   :  { %v1896_v41 = vadd.f32 %v2830_v39, %v1856_v38 }
 0x282   :  { %v2832_v42 = vpop.f32.mrf.mxu1 }
 0x283   :  { %v1903_v43 = vmax.f32 %v1896_v41, 0.0 }
 0x285   :  { %v1906_v44 = vpack.c.bf16 %v1903_v43, %v1903_v43 }
 0x287   :  { %2281 = vmatmul.mubr.bf16.vlgmr.msra.gmra.mxu1 %v1906_v44 }
 0x288   :  { %2835 = vmatpush3.bf16.msra.mxu1 %v3265_v46 }
 0x289   :  { %2836 = vmatprep.subr.bf16.mxu1 %v3266_v47 }
 0x28c   :  { %2837 = vmatpush3.bf16.msra.mxu1 %v3267_v49 }
 0x28d   :  { %2838 = vmatprep.subr.bf16.mxu1 %v3268_v13 }
 0x290   :  { %2839 = vmatpush3.bf16.msra.mxu1 %v3269_v48 }
 0x291   :  { %2840 = vmatprep.subr.bf16.mxu1 %v3270_v50 }
 0x294   :  { %2841 = vmatpush3.bf16.msra.mxu1 %v3271_v51 }
 0x295   :  { %2842 = vmatprep.subr.bf16.mxu1 %v3272_v52 }
 0x298   :  { %2843 = vmatpush3.bf16.msra.mxu1 %v3273_v53 }
 0x299   :  { %2844 = vmatprep.subr.bf16.mxu1 %v3274_v54 }
 0x29c   :  { %2845 = vmatpush3.bf16.msra.mxu1 %v3275_v55 }
 0x29d   :  { %2846 = vmatprep.subr.bf16.mxu1 %v3276_v56 }
 0x2a0   :  { %2847 = vmatpush3.bf16.msra.mxu1 %v3277_v57 }
 0x2a1   :  { %2848 = vmatprep.subr.bf16.mxu1 %v3278_v58 }
 0x2a4   :  { %2849 = vmatpush3.bf16.msra.mxu1 %v3279_v59 }
 0x326   :  { %v2241_v60 = vpop.f32.mrf.mxu0 }
 0x327   :  { %v2242_v3 = vadd.f32 %v2241_v60, %v1960_v1 }
 0x328   :  { %v2243_v61 = vpop.f32.mrf.mxu0 }
 0x329   :  { %v2244_v5 = vadd.f32 %v2243_v61, %v1964_v2 }
 0x32a   :  { %v2245_v62 = vpop.f32.mrf.mxu0 }
 0x32c   :  { %v2246_v63 = vpop.f32.mrf.mxu0 }
 0x347   :  { %v2282_v4 = vpop.f32.mrf.mxu1 }
 0x348   :  { %v2283_v6 = vadd.f32 %v2282_v4, %v2242_v3 }
 0x349   :  { %v2284_v7 = vpop.f32.mrf.mxu1 }
 0x34a   :  { %v2285_v10 = vadd.f32 %v2284_v7, %v2244_v5  ;;  %v2289_v11 = vmax.f32 %v2283_v6, 0.0 }
 0x34b   :  { %v2286_v12 = vpop.f32.mrf.mxu1 }
 0x34c   :  { %v2290_v15 = vmax.f32 %v2285_v10, 0.0  ;;  %v2291_v19 = vpack.c.bf16 %v2289_v11, %v2289_v11 }
 0x34d   :  { %v2287_v17 = vpop.f32.mrf.mxu1 }
 0x34e   :  { %v2292_v18 = vpack.c.bf16 %v2290_v15, %v2290_v15 }
 0x350   :  { %2460 = vmatprep.mubr.bf16.mxu1 %v2292_v18 }
 0x351   :  { %2461 = vmatmul.mubr.bf16.vlgmr.msra.gmra.mxu1 %v2291_v19 }
 0x411   :  { %v2850_v20 = vpop.f32.mrf.mxu1 }
 0x413   :  { %v2851_v16 = vpop.f32.mrf.mxu1 }
 0x414   :  { %v2852_v8 = vadd.f32 %v2851_v16, %v2850_v20 }
 0x415   :  { %v2853_v21 = vpop.f32.mrf.mxu1 }
 0x416   :  { %v2463_v9 = vadd.f32 %v2852_v8, %v2773_v14 }
 0x417   :  { %v2854_v22 = vpop.f32.mrf.mxu1 }
 0x418   :  { %v2469_v23 = vmin.f32 %v2463_v9, 20.0  ;;  %vm2468_vm1 = vcmp.gt.f32.partialorder %v2463_v9, 20.0 }
 0x41a   :  { %v2470_v24 = vmul.f32 1.442695, %v2469_v23 }
 0x41c   :  { %3280 = vpow2.f32 %v2470_v24 }
 0x429   :  { %v3281_v25 = vpop.eup %3280 }
 0x42a   :  { %v2472_v26 = vadd.f32 1.0, %v3281_v25  ;;  %v2475_v27 = vmul.f32 -0.5, %v3281_v25  ;;  %v2478_v29 = vand.u32 2147483647, %v3281_v25 }
 0x42c   :  { %3282 = vlog2.f32 %v2472_v26  ;;  %v2476_v28 = vadd.f32 1.0, %v2475_v27  ;;  %vm2479_vm0 = vcmp.lt.f32.partialorder %v2478_v29, 0.0004427343 }
 0x42e   :  { %v2477_v32 = vmul.f32 %v3281_v25, %v2476_v28 }
 0x439   :  { %v3283_v30 = vpop.eup %3282 }
 0x43a   :  { %v2474_v31 = vmul.f32 0.6931472, %v3283_v30 }
 0x43c   :  { %v2480_v33 = vsel %vm2479_vm0, %v2477_v32, %v2474_v31 }
 0x43d   :  { %v2481_v34 = vsel %vm2468_vm1, %v2463_v9, %v2480_v33 }
 0x43e   :  { %2482 = vst [vmem:[#allocation13] sm:$0xff] %v2481_v34 }
 0x43f   :  { %3415 = shalt.err (!%p3412_p6)
}
 0x440   :  { %2492 = dma.vmem_to_hbm [thread:$0]  %s2490_s25, 128, %s3571_s9, [#allocation4]  }
 0x441   :  { %3432 = dma.done.wait [#allocation4], 128  }
 0x442   :  { %3433 = vsyncadd [#allocation4], 4294967168 }
 0x443   :  { %2496 = vsyncpa [#allocation3], 1 }
 0x444   :  { %2497 = vsyncpa [#allocation6], 1 }
 0x445   :  { %2498 = vsyncpa [#allocation9], 1 }
 0x446   :  { %2499 = vsyncpa [#allocation12], 1 }
 0x447   :  { %2500 = vsyncpa [#allocation4], 1 }

</bundles_post_ra>
